<compile_context>
chip_gen: v6e
topology: v6e:2x2x1
jax: 0.10.0
libtpu: 0.0.40
codegen_flags: <defaults>
</compile_context>

<pallas_src>
import jax
import jax.numpy as jnp
from jax.experimental import pallas as pl
from jax.experimental.pallas import tpu as pltpu

_VMEM_LIMIT = 32 * 1024 * 1024  # explicit, safe on v5e (16 MiB default) and v7x


def _round_up(x, m):
    return ((x + m - 1) // m) * m


# ----------------------------------------------------------------------------
# Pallas kernels
# ----------------------------------------------------------------------------
def _conv_relu_pool_kernel(w_ref, p00_ref, p01_ref, p10_ref, p11_ref, b_ref,
                           o_ref):
    """out = relu(max_{4 pool offsets}(W @ p_offset) + b), lane-dense over M."""
    w = w_ref[...]
    z = jnp.dot(w, p00_ref[...], preferred_element_type=jnp.float32)
    z = jnp.maximum(z, jnp.dot(w, p01_ref[...],
                               preferred_element_type=jnp.float32))
    z = jnp.maximum(z, jnp.dot(w, p10_ref[...],
                               preferred_element_type=jnp.float32))
    z = jnp.maximum(z, jnp.dot(w, p11_ref[...],
                               preferred_element_type=jnp.float32))
    z = z + b_ref[...]                       # bias broadcast over lanes (M)
    o_ref[...] = jnp.maximum(z, 0.0).astype(o_ref.dtype)


def conv_relu_pool_gemm(w_mat, patches, bias, *, tile_m=512):
    """Fused conv+bias+relu+2x2 maxpool as 4 GEMMs + elementwise max.

    w_mat:   (Cout, K)   GEMM-shaped conv weights.
    patches: 4 arrays (K, M), one per pooling offset; M = Hp*Wp*N (pooled).
    bias:    (Cout,)
    Returns (Cout, M) float32.
    """
    Cout, K = w_mat.shape
    Kp, M = patches[0].shape
    assert Kp == K
    tile_m = min(tile_m, _round_up(M, 128))
    grid = (pl.cdiv(M, tile_m),)             # ragged final block handled by Pallas

    p_spec = pl.BlockSpec((K, tile_m), lambda i: (0, i))
    return pl.pallas_call(
        _conv_relu_pool_kernel,
        out_shape=jax.ShapeDtypeStruct((Cout, M), jnp.float32),
        grid=grid,
        in_specs=[
            pl.BlockSpec((Cout, K), lambda i: (0, 0)),   # weights stay resident
            p_spec, p_spec, p_spec, p_spec,
            pl.BlockSpec((Cout, 1), lambda i: (0, 0)),
        ],
        out_specs=pl.BlockSpec((Cout, tile_m), lambda i: (0, i)),
        compiler_params=pltpu.CompilerParams(
            dimension_semantics=("parallel",),
            vmem_limit_bytes=_VMEM_LIMIT),
    )(w_mat, *patches, bias.reshape(Cout, 1))


def _fc_chain_kernel(x_ref, w1_ref, b1_ref, w2_ref, b2_ref, w3_ref, b3_ref,
                     o_ref):
    h = jnp.dot(w1_ref[...], x_ref[...],
                preferred_element_type=jnp.float32) + b1_ref[...]
    h = jnp.maximum(h, 0.0)
    h = jnp.dot(w2_ref[...], h,
                preferred_element_type=jnp.float32) + b2_ref[...]
    h = jnp.maximum(h, 0.0)
    y = jnp.dot(w3_ref[...], h,
                preferred_element_type=jnp.float32) + b3_ref[...]
    o_ref[...] = y.astype(o_ref.dtype)


def fc_chain(x_t, w1, b1, w2, b2, w3, b3, *, tile_n=512):
    """Fused fc1(ReLU) -> fc2(ReLU) -> fc3.  x_t: (features, N) -> (10, N)."""
    F, N = x_t.shape
    D1, D2, D3 = w1.shape[0], w2.shape[0], w3.shape[0]
    tile_n = min(tile_n, _round_up(N, 128))
    grid = (pl.cdiv(N, tile_n),)

    def full(r, c):
        return pl.BlockSpec((r, c), lambda i: (0, 0))

    return pl.pallas_call(
        _fc_chain_kernel,
        out_shape=jax.ShapeDtypeStruct((D3, N), jnp.float32),
        grid=grid,
        in_specs=[
            pl.BlockSpec((F, tile_n), lambda i: (0, i)),
            full(D1, F), full(D1, 1),
            full(D2, D1), full(D2, 1),
            full(D3, D2), full(D3, 1),
        ],
        out_specs=pl.BlockSpec((D3, tile_n), lambda i: (0, i)),
        compiler_params=pltpu.CompilerParams(
            dimension_semantics=("parallel",),
            vmem_limit_bytes=_VMEM_LIMIT),
    )(x_t, w1, b1.reshape(D1, 1), w2, b2.reshape(D2, 1), w3, b3.reshape(D3, 1))


# ----------------------------------------------------------------------------
# Layer wrappers (JAX glue is strided slices / reshapes only)
# ----------------------------------------------------------------------------
def conv_relu_pool(x_chwn, w_mat, bias, kh, kw):
    """Valid conv (stride 1) + bias + ReLU + 2x2/2 maxpool in (C,H,W,N) layout.

    Builds one im2col patch set per pooling offset (dy, dx) so the Pallas
    kernel emits the pooled activation directly (no pre-pool HBM round-trip).
    """
    C, H, W, N = x_chwn.shape
    Ho, Wo = H - kh + 1, W - kw + 1
    Hp, Wp = Ho // 2, Wo // 2                      # floor, matches nn.MaxPool2d(2,2)
    patches = []
    for dy in range(2):
        for dx in range(2):
            taps = [
                x_chwn[:, dy + i: dy + i + 2 * Hp - 1: 2,
                       dx + j: dx + j + 2 * Wp - 1: 2, :]
                for i in range(kh) for j in range(kw)
            ]                                       # each (C, Hp, Wp, N)
            p = jnp.stack(taps, axis=1)             # (C, kh*kw, Hp, Wp, N)
            patches.append(p.reshape(C * kh * kw, Hp * Wp * N))
    out = conv_relu_pool_gemm(w_mat, patches, bias)  # (Cout, Hp*Wp*N)
    return out.reshape(out.shape[0], Hp, Wp, N)


# ----------------------------------------------------------------------------
# Net (LeNet-style, CIFAR-10 shapes)
# ----------------------------------------------------------------------------
def init_params(key):
    """PyTorch-shaped parameters with torch-default-style uniform init."""
    def uniform(k, shape, fan_in):
        bound = 1.0 / jnp.sqrt(jnp.float32(fan_in))
        return jax.random.uniform(k, shape, jnp.float32, -bound, bound)

    ks = jax.random.split(key, 10)
    return {
        "conv1_w": uniform(ks[0], (6, 3, 5, 5), 3 * 5 * 5),
        "conv1_b": uniform(ks[1], (6,), 3 * 5 * 5),
        "conv2_w": uniform(ks[2], (16, 6, 5, 5), 6 * 5 * 5),
        "conv2_b": uniform(ks[3], (16,), 6 * 5 * 5),
        "fc1_w": uniform(ks[4], (120, 16 * 5 * 5), 16 * 5 * 5),
        "fc1_b": uniform(ks[5], (120,), 16 * 5 * 5),
        "fc2_w": uniform(ks[6], (84, 120), 120),
        "fc2_b": uniform(ks[7], (84,), 120),
        "fc3_w": uniform(ks[8], (10, 84), 84),
        "fc3_b": uniform(ks[9], (10,), 84),
    }


def prepare_params(p):
    """One-time kernel-layout prep: GEMM-shaped conv weights, Cout 6->8 pad."""
    C1_PAD = 8                                   # conv1: Cout 6->8 (aligned stores)
    C2_IN_PAD = 8                                # conv2 consumes 8-ch activations

    w1_mat = p["conv1_w"].reshape(6, 3 * 25)     # (6, 75)
    w1_mat = jnp.pad(w1_mat, ((0, C1_PAD - 6), (0, 0)))
    b1 = jnp.pad(p["conv1_b"], (0, C1_PAD - 6))

    w2 = jnp.pad(p["conv2_w"], ((0, 0), (0, C2_IN_PAD - 6), (0, 0), (0, 0)))
    w2_mat = w2.reshape(16, C2_IN_PAD * 25)      # (16, 200)

    return {
        "conv1_w_mat": w1_mat, "conv1_b": b1,
        "conv2_w_mat": w2_mat, "conv2_b": p["conv2_b"],
        "fc1_w": p["fc1_w"], "fc1_b": p["fc1_b"],
        "fc2_w": p["fc2_w"], "fc2_b": p["fc2_b"],
        "fc3_w": p["fc3_w"], "fc3_b": p["fc3_b"],
    }


def net_forward(params, x):
    """x: (N, 3, 32, 32) NCHW (PyTorch convention) -> (N, 10) logits."""
    N = x.shape[0]
    a = jnp.transpose(x, (1, 2, 3, 0))                     # (3,32,32,N), one-time relayout

    a = conv_relu_pool(a, params["conv1_w_mat"], params["conv1_b"], 5, 5)  # (8,14,14,N)
    a = conv_relu_pool(a, params["conv2_w_mat"], params["conv2_b"], 5, 5)  # (16,5,5,N)

    x_t = a.reshape(16 * 5 * 5, N)                          # == torch.flatten(x, 1).T
    y_t = fc_chain(x_t,
                   params["fc1_w"], params["fc1_b"],
                   params["fc2_w"], params["fc2_b"],
                   params["fc3_w"], params["fc3_b"])        # (10, N)
    return y_t.T                                            # (N, 10)


# ----------------------------------------------------------------------------
# Pure-JAX reference (for correctness check only)
# ----------------------------------------------------------------------------
def reference_forward(p, x):
    def conv(x, w, b):
        y = jax.lax.conv_general_dilated(
            x, w, (1, 1), "VALID",
            dimension_numbers=("NCHW", "OIHW", "NCHW"))
        return y + b.reshape(1, -1, 1, 1)

    def pool(x):
        return jax.lax.reduce_window(x, -jnp.inf, jax.lax.max,
                                     (1, 1, 2, 2), (1, 1, 2, 2), "VALID")

    a = pool(jax.nn.relu(conv(x, p["conv1_w"], p["conv1_b"])))
    a = pool(jax.nn.relu(conv(a, p["conv2_w"], p["conv2_b"])))
    a = a.reshape(a.shape[0], -1)
    a = jax.nn.relu(a @ p["fc1_w"].T + p["fc1_b"])
    a = jax.nn.relu(a @ p["fc2_w"].T + p["fc2_b"])
    return a @ p["fc3_w"].T + p["fc3_b"]


if __name__ == "__main__":
    key = jax.random.PRNGKey(0)
    kp, kx = jax.random.split(key)
    raw = init_params(kp)
    params = prepare_params(raw)
    # fc1 expects 16*5*5 features, which forces 3x32x32 inputs (CIFAR-10).
    x = jax.random.normal(kx, (2, 3, 32, 32), dtype=jnp.float32)

    out = jax.block_until_ready(jax.jit(net_forward)(params, x))
    assert out.shape == (2, 10) and out.dtype == jnp.float32
    assert bool(jnp.all(jnp.isfinite(out)))

    ref = reference_forward(raw, x)
    err = float(jnp.max(jnp.abs(out - ref)))
    assert err < 1e-3, f"max abs error vs reference: {err}"
    print("KERNEL_OK")
</pallas_src>

<mosaic_0001>
module attributes {stable_mosaic.version = 11 : i64} {
  func.func @_conv_relu_pool_kernel(%arg0: i32, %arg1: memref<8x75xf32, #tpu.memory_space<vmem>>, %arg2: memref<75x512xf32, #tpu.memory_space<vmem>>, %arg3: memref<75x512xf32, #tpu.memory_space<vmem>>, %arg4: memref<75x512xf32, #tpu.memory_space<vmem>>, %arg5: memref<75x512xf32, #tpu.memory_space<vmem>>, %arg6: memref<8x1xf32, #tpu.memory_space<vmem>>, %arg7: memref<8x512xf32, #tpu.memory_space<vmem>>) attributes {dimension_semantics = [#tpu.dimension_semantics<parallel>], iteration_bounds = array<i64: 1>, scalar_prefetch = 0 : i64, scratch_operands = 0 : i64, tpu.core_type = #tpu.core_type<tc>, window_params = [{pipeline_mode = #tpu.pipeline_mode<synchronous>, transform_indices = @transform_0, window_bounds = array<i64: 8, 75>}, {transform_indices = @transform_1, window_bounds = array<i64: 75, 512>}, {transform_indices = @transform_2, window_bounds = array<i64: 75, 512>}, {transform_indices = @transform_3, window_bounds = array<i64: 75, 512>}, {transform_indices = @transform_4, window_bounds = array<i64: 75, 512>}, {pipeline_mode = #tpu.pipeline_mode<synchronous>, transform_indices = @transform_5, window_bounds = array<i64: 8, 1>}, {transform_indices = @transform_6, window_bounds = array<i64: 8, 512>}]} {
    %c0 = arith.constant 0 : index
    %c0_0 = arith.constant 0 : index
    %0 = vector.load %arg1[%c0, %c0_0] : memref<8x75xf32, #tpu.memory_space<vmem>>, vector<8x75xf32>
    %c0_1 = arith.constant 0 : index
    %c0_2 = arith.constant 0 : index
    %1 = vector.load %arg2[%c0_1, %c0_2] : memref<75x512xf32, #tpu.memory_space<vmem>>, vector<75x512xf32>
    %cst = arith.constant dense<0.000000e+00> : vector<8x512xf32>
    %2 = tpu.matmul %0, %1, %cst {dimension_numbers = #tpu.dot_dimension_numbers<[1], [0], [0], [1], [0, 0, 1, 1], [], []>} : vector<8x75xf32>, vector<75x512xf32>, vector<8x512xf32> -> vector<8x512xf32>
    %c0_3 = arith.constant 0 : index
    %c0_4 = arith.constant 0 : index
    %3 = vector.load %arg3[%c0_3, %c0_4] : memref<75x512xf32, #tpu.memory_space<vmem>>, vector<75x512xf32>
    %cst_5 = arith.constant dense<0.000000e+00> : vector<8x512xf32>
    %4 = tpu.matmul %0, %3, %cst_5 {dimension_numbers = #tpu.dot_dimension_numbers<[1], [0], [0], [1], [0, 0, 1, 1], [], []>} : vector<8x75xf32>, vector<75x512xf32>, vector<8x512xf32> -> vector<8x512xf32>
    %5 = arith.maximumf %2, %4 : vector<8x512xf32>
    %c0_6 = arith.constant 0 : index
    %c0_7 = arith.constant 0 : index
    %6 = vector.load %arg4[%c0_6, %c0_7] : memref<75x512xf32, #tpu.memory_space<vmem>>, vector<75x512xf32>
    %cst_8 = arith.constant dense<0.000000e+00> : vector<8x512xf32>
    %7 = tpu.matmul %0, %6, %cst_8 {dimension_numbers = #tpu.dot_dimension_numbers<[1], [0], [0], [1], [0, 0, 1, 1], [], []>} : vector<8x75xf32>, vector<75x512xf32>, vector<8x512xf32> -> vector<8x512xf32>
    %8 = arith.maximumf %5, %7 : vector<8x512xf32>
    %c0_9 = arith.constant 0 : index
    %c0_10 = arith.constant 0 : index
    %9 = vector.load %arg5[%c0_9, %c0_10] : memref<75x512xf32, #tpu.memory_space<vmem>>, vector<75x512xf32>
    %cst_11 = arith.constant dense<0.000000e+00> : vector<8x512xf32>
    %10 = tpu.matmul %0, %9, %cst_11 {dimension_numbers = #tpu.dot_dimension_numbers<[1], [0], [0], [1], [0, 0, 1, 1], [], []>} : vector<8x75xf32>, vector<75x512xf32>, vector<8x512xf32> -> vector<8x512xf32>
    %11 = arith.maximumf %8, %10 : vector<8x512xf32>
    %c0_12 = arith.constant 0 : index
    %c0_13 = arith.constant 0 : index
    %12 = vector.load %arg6[%c0_12, %c0_13] : memref<8x1xf32, #tpu.memory_space<vmem>>, vector<8x1xf32>
    %13 = vector.broadcast %12 : vector<8x1xf32> to vector<8x512xf32>
    %14 = arith.addf %11, %13 : vector<8x512xf32>
    %cst_14 = arith.constant 0.000000e+00 : f32
    %15 = vector.broadcast %cst_14 : f32 to vector<8x512xf32>
    %16 = arith.maximumf %14, %15 : vector<8x512xf32>
    %c0_15 = arith.constant 0 : index
    %c0_16 = arith.constant 0 : index
    %17 = vector.load %arg7[%c0_15, %c0_16] : memref<8x512xf32, #tpu.memory_space<vmem>>, vector<8x512xf32>
    tpu.vector_store %arg7[%c0_15, %c0_16], %16 {strides = array<i32>} : memref<8x512xf32, #tpu.memory_space<vmem>>, vector<8x512xf32>,
    return
  }
  func.func @transform_0(%arg0: i32) -> (i32, i32) {
    %c0_i32 = arith.constant 0 : i32
    %c0_i32_0 = arith.constant 0 : i32
    %c0_i32_1 = arith.constant 0 : i32
    return %c0_i32, %c0_i32_0 : i32, i32
  }
  func.func @transform_1(%arg0: i32) -> (i32, i32) {
    %c0_i32 = arith.constant 0 : i32
    %c0_i32_0 = arith.constant 0 : i32
    return %c0_i32, %arg0 : i32, i32
  }
  func.func @transform_2(%arg0: i32) -> (i32, i32) {
    %c0_i32 = arith.constant 0 : i32
    %c0_i32_0 = arith.constant 0 : i32
    return %c0_i32, %arg0 : i32, i32
  }
  func.func @transform_3(%arg0: i32) -> (i32, i32) {
    %c0_i32 = arith.constant 0 : i32
    %c0_i32_0 = arith.constant 0 : i32
    return %c0_i32, %arg0 : i32, i32
  }
  func.func @transform_4(%arg0: i32) -> (i32, i32) {
    %c0_i32 = arith.constant 0 : i32
    %c0_i32_0 = arith.constant 0 : i32
    return %c0_i32, %arg0 : i32, i32
  }
  func.func @transform_5(%arg0: i32) -> (i32, i32) {
    %c0_i32 = arith.constant 0 : i32
    %c0_i32_0 = arith.constant 0 : i32
    %c0_i32_1 = arith.constant 0 : i32
    return %c0_i32, %c0_i32_0 : i32, i32
  }
  func.func @transform_6(%arg0: i32) -> (i32, i32) {
    %c0_i32 = arith.constant 0 : i32
    %c0_i32_0 = arith.constant 0 : i32
    return %c0_i32, %arg0 : i32, i32
  }
}

module attributes {stable_mosaic.version = 11 : i64} {
  func.func @_conv_relu_pool_kernel(%arg0: i32, %arg1: memref<16x200xf32, #tpu.memory_space<vmem>>, %arg2: memref<200x128xf32, #tpu.memory_space<vmem>>, %arg3: memref<200x128xf32, #tpu.memory_space<vmem>>, %arg4: memref<200x128xf32, #tpu.memory_space<vmem>>, %arg5: memref<200x128xf32, #tpu.memory_space<vmem>>, %arg6: memref<16x1xf32, #tpu.memory_space<vmem>>, %arg7: memref<16x128xf32, #tpu.memory_space<vmem>>) attributes {dimension_semantics = [#tpu.dimension_semantics<parallel>], iteration_bounds = array<i64: 1>, scalar_prefetch = 0 : i64, scratch_operands = 0 : i64, tpu.core_type = #tpu.core_type<tc>, window_params = [{pipeline_mode = #tpu.pipeline_mode<synchronous>, transform_indices = @transform_0, window_bounds = array<i64: 16, 200>}, {transform_indices = @transform_1, window_bounds = array<i64: 200, 128>}, {transform_indices = @transform_2, window_bounds = array<i64: 200, 128>}, {transform_indices = @transform_3, window_bounds = array<i64: 200, 128>}, {transform_indices = @transform_4, window_bounds = array<i64: 200, 128>}, {pipeline_mode = #tpu.pipeline_mode<synchronous>, transform_indices = @transform_5, window_bounds = array<i64: 16, 1>}, {transform_indices = @transform_6, window_bounds = array<i64: 16, 128>}]} {
    %c0 = arith.constant 0 : index
    %c0_0 = arith.constant 0 : index
    %0 = vector.load %arg1[%c0, %c0_0] : memref<16x200xf32, #tpu.memory_space<vmem>>, vector<16x200xf32>
    %c0_1 = arith.constant 0 : index
    %c0_2 = arith.constant 0 : index
    %1 = vector.load %arg2[%c0_1, %c0_2] : memref<200x128xf32, #tpu.memory_space<vmem>>, vector<200x128xf32>
    %cst = arith.constant dense<0.000000e+00> : vector<16x128xf32>
    %2 = tpu.matmul %0, %1, %cst {dimension_numbers = #tpu.dot_dimension_numbers<[1], [0], [0], [1], [0, 0, 1, 1], [], []>} : vector<16x200xf32>, vector<200x128xf32>, vector<16x128xf32> -> vector<16x128xf32>
    %c0_3 = arith.constant 0 : index
    %c0_4 = arith.constant 0 : index
    %3 = vector.load %arg3[%c0_3, %c0_4] : memref<200x128xf32, #tpu.memory_space<vmem>>, vector<200x128xf32>
    %cst_5 = arith.constant dense<0.000000e+00> : vector<16x128xf32>
    %4 = tpu.matmul %0, %3, %cst_5 {dimension_numbers = #tpu.dot_dimension_numbers<[1], [0], [0], [1], [0, 0, 1, 1], [], []>} : vector<16x200xf32>, vector<200x128xf32>, vector<16x128xf32> -> vector<16x128xf32>
    %5 = arith.maximumf %2, %4 : vector<16x128xf32>
    %c0_6 = arith.constant 0 : index
    %c0_7 = arith.constant 0 : index
    %6 = vector.load %arg4[%c0_6, %c0_7] : memref<200x128xf32, #tpu.memory_space<vmem>>, vector<200x128xf32>
    %cst_8 = arith.constant dense<0.000000e+00> : vector<16x128xf32>
    %7 = tpu.matmul %0, %6, %cst_8 {dimension_numbers = #tpu.dot_dimension_numbers<[1], [0], [0], [1], [0, 0, 1, 1], [], []>} : vector<16x200xf32>, vector<200x128xf32>, vector<16x128xf32> -> vector<16x128xf32>
    %8 = arith.maximumf %5, %7 : vector<16x128xf32>
    %c0_9 = arith.constant 0 : index
    %c0_10 = arith.constant 0 : index
    %9 = vector.load %arg5[%c0_9, %c0_10] : memref<200x128xf32, #tpu.memory_space<vmem>>, vector<200x128xf32>
    %cst_11 = arith.constant dense<0.000000e+00> : vector<16x128xf32>
    %10 = tpu.matmul %0, %9, %cst_11 {dimension_numbers = #tpu.dot_dimension_numbers<[1], [0], [0], [1], [0, 0, 1, 1], [], []>} : vector<16x200xf32>, vector<200x128xf32>, vector<16x128xf32> -> vector<16x128xf32>
    %11 = arith.maximumf %8, %10 : vector<16x128xf32>
    %c0_12 = arith.constant 0 : index
    %c0_13 = arith.constant 0 : index
    %12 = vector.load %arg6[%c0_12, %c0_13] : memref<16x1xf32, #tpu.memory_space<vmem>>, vector<16x1xf32>
    %13 = vector.broadcast %12 : vector<16x1xf32> to vector<16x128xf32>
    %14 = arith.addf %11, %13 : vector<16x128xf32>
    %cst_14 = arith.constant 0.000000e+00 : f32
    %15 = vector.broadcast %cst_14 : f32 to vector<16x128xf32>
    %16 = arith.maximumf %14, %15 : vector<16x128xf32>
    %c0_15 = arith.constant 0 : index
    %c0_16 = arith.constant 0 : index
    %17 = vector.load %arg7[%c0_15, %c0_16] : memref<16x128xf32, #tpu.memory_space<vmem>>, vector<16x128xf32>
    tpu.vector_store %arg7[%c0_15, %c0_16], %16 {strides = array<i32>} : memref<16x128xf32, #tpu.memory_space<vmem>>, vector<16x128xf32>,
    return
  }
  func.func @transform_0(%arg0: i32) -> (i32, i32) {
    %c0_i32 = arith.constant 0 : i32
    %c0_i32_0 = arith.constant 0 : i32
    %c0_i32_1 = arith.constant 0 : i32
    return %c0_i32, %c0_i32_0 : i32, i32
  }
  func.func @transform_1(%arg0: i32) -> (i32, i32) {
    %c0_i32 = arith.constant 0 : i32
    %c0_i32_0 = arith.constant 0 : i32
    return %c0_i32, %arg0 : i32, i32
  }
  func.func @transform_2(%arg0: i32) -> (i32, i32) {
    %c0_i32 = arith.constant 0 : i32
    %c0_i32_0 = arith.constant 0 : i32
    return %c0_i32, %arg0 : i32, i32
  }
  func.func @transform_3(%arg0: i32) -> (i32, i32) {
    %c0_i32 = arith.constant 0 : i32
    %c0_i32_0 = arith.constant 0 : i32
    return %c0_i32, %arg0 : i32, i32
  }
  func.func @transform_4(%arg0: i32) -> (i32, i32) {
    %c0_i32 = arith.constant 0 : i32
    %c0_i32_0 = arith.constant 0 : i32
    return %c0_i32, %arg0 : i32, i32
  }
  func.func @transform_5(%arg0: i32) -> (i32, i32) {
    %c0_i32 = arith.constant 0 : i32
    %c0_i32_0 = arith.constant 0 : i32
    %c0_i32_1 = arith.constant 0 : i32
    return %c0_i32, %c0_i32_0 : i32, i32
  }
  func.func @transform_6(%arg0: i32) -> (i32, i32) {
    %c0_i32 = arith.constant 0 : i32
    %c0_i32_0 = arith.constant 0 : i32
    return %c0_i32, %arg0 : i32, i32
  }
}

module attributes {stable_mosaic.version = 11 : i64} {
  func.func @_fc_chain_kernel(%arg0: i32, %arg1: memref<400x128xf32, #tpu.memory_space<vmem>>, %arg2: memref<120x400xf32, #tpu.memory_space<vmem>>, %arg3: memref<120x1xf32, #tpu.memory_space<vmem>>, %arg4: memref<84x120xf32, #tpu.memory_space<vmem>>, %arg5: memref<84x1xf32, #tpu.memory_space<vmem>>, %arg6: memref<10x84xf32, #tpu.memory_space<vmem>>, %arg7: memref<10x1xf32, #tpu.memory_space<vmem>>, %arg8: memref<10x128xf32, #tpu.memory_space<vmem>>) attributes {dimension_semantics = [#tpu.dimension_semantics<parallel>], iteration_bounds = array<i64: 1>, scalar_prefetch = 0 : i64, scratch_operands = 0 : i64, tpu.core_type = #tpu.core_type<tc>, window_params = [{transform_indices = @transform_0, window_bounds = array<i64: 400, 128>}, {pipeline_mode = #tpu.pipeline_mode<synchronous>, transform_indices = @transform_1, window_bounds = array<i64: 120, 400>}, {pipeline_mode = #tpu.pipeline_mode<synchronous>, transform_indices = @transform_2, window_bounds = array<i64: 120, 1>}, {pipeline_mode = #tpu.pipeline_mode<synchronous>, transform_indices = @transform_3, window_bounds = array<i64: 84, 120>}, {pipeline_mode = #tpu.pipeline_mode<synchronous>, transform_indices = @transform_4, window_bounds = array<i64: 84, 1>}, {pipeline_mode = #tpu.pipeline_mode<synchronous>, transform_indices = @transform_5, window_bounds = array<i64: 10, 84>}, {pipeline_mode = #tpu.pipeline_mode<synchronous>, transform_indices = @transform_6, window_bounds = array<i64: 10, 1>}, {transform_indices = @transform_7, window_bounds = array<i64: 10, 128>}]} {
    %c0 = arith.constant 0 : index
    %c0_0 = arith.constant 0 : index
    %0 = vector.load %arg2[%c0, %c0_0] : memref<120x400xf32, #tpu.memory_space<vmem>>, vector<120x400xf32>
    %c0_1 = arith.constant 0 : index
    %c0_2 = arith.constant 0 : index
    %1 = vector.load %arg1[%c0_1, %c0_2] : memref<400x128xf32, #tpu.memory_space<vmem>>, vector<400x128xf32>
    %cst = arith.constant dense<0.000000e+00> : vector<120x128xf32>
    %2 = tpu.matmul %0, %1, %cst {dimension_numbers = #tpu.dot_dimension_numbers<[1], [0], [0], [1], [0, 0, 1, 1], [], []>} : vector<120x400xf32>, vector<400x128xf32>, vector<120x128xf32> -> vector<120x128xf32>
    %c0_3 = arith.constant 0 : index
    %c0_4 = arith.constant 0 : index
    %3 = vector.load %arg3[%c0_3, %c0_4] : memref<120x1xf32, #tpu.memory_space<vmem>>, vector<120x1xf32>
    %4 = vector.broadcast %3 : vector<120x1xf32> to vector<120x128xf32>
    %5 = arith.addf %2, %4 : vector<120x128xf32>
    %cst_5 = arith.constant 0.000000e+00 : f32
    %6 = vector.broadcast %cst_5 : f32 to vector<120x128xf32>
    %7 = arith.maximumf %5, %6 : vector<120x128xf32>
    %c0_6 = arith.constant 0 : index
    %c0_7 = arith.constant 0 : index
    %8 = vector.load %arg4[%c0_6, %c0_7] : memref<84x120xf32, #tpu.memory_space<vmem>>, vector<84x120xf32>
    %cst_8 = arith.constant dense<0.000000e+00> : vector<84x128xf32>
    %9 = tpu.matmul %8, %7, %cst_8 {dimension_numbers = #tpu.dot_dimension_numbers<[1], [0], [0], [1], [0, 0, 1, 1], [], []>} : vector<84x120xf32>, vector<120x128xf32>, vector<84x128xf32> -> vector<84x128xf32>
    %c0_9 = arith.constant 0 : index
    %c0_10 = arith.constant 0 : index
    %10 = vector.load %arg5[%c0_9, %c0_10] : memref<84x1xf32, #tpu.memory_space<vmem>>, vector<84x1xf32>
    %11 = vector.broadcast %10 : vector<84x1xf32> to vector<84x128xf32>
    %12 = arith.addf %9, %11 : vector<84x128xf32>
    %cst_11 = arith.constant 0.000000e+00 : f32
    %13 = vector.broadcast %cst_11 : f32 to vector<84x128xf32>
    %14 = arith.maximumf %12, %13 : vector<84x128xf32>
    %c0_12 = arith.constant 0 : index
    %c0_13 = arith.constant 0 : index
    %15 = vector.load %arg6[%c0_12, %c0_13] : memref<10x84xf32, #tpu.memory_space<vmem>>, vector<10x84xf32>
    %cst_14 = arith.constant dense<0.000000e+00> : vector<10x128xf32>
    %16 = tpu.matmul %15, %14, %cst_14 {dimension_numbers = #tpu.dot_dimension_numbers<[1], [0], [0], [1], [0, 0, 1, 1], [], []>} : vector<10x84xf32>, vector<84x128xf32>, vector<10x128xf32> -> vector<10x128xf32>
    %c0_15 = arith.constant 0 : index
    %c0_16 = arith.constant 0 : index
    %17 = vector.load %arg7[%c0_15, %c0_16] : memref<10x1xf32, #tpu.memory_space<vmem>>, vector<10x1xf32>
    %18 = vector.broadcast %17 : vector<10x1xf32> to vector<10x128xf32>
    %19 = arith.addf %16, %18 : vector<10x128xf32>
    %c0_17 = arith.constant 0 : index
    %c0_18 = arith.constant 0 : index
    %20 = vector.load %arg8[%c0_17, %c0_18] : memref<10x128xf32, #tpu.memory_space<vmem>>, vector<10x128xf32>
    tpu.vector_store %arg8[%c0_17, %c0_18], %19 {strides = array<i32>} : memref<10x128xf32, #tpu.memory_space<vmem>>, vector<10x128xf32>,
    return
  }
  func.func @transform_0(%arg0: i32) -> (i32, i32) {
    %c0_i32 = arith.constant 0 : i32
    %c0_i32_0 = arith.constant 0 : i32
    return %c0_i32, %arg0 : i32, i32
  }
  func.func @transform_1(%arg0: i32) -> (i32, i32) {
    %c0_i32 = arith.constant 0 : i32
    %c0_i32_0 = arith.constant 0 : i32
    %c0_i32_1 = arith.constant 0 : i32
    return %c0_i32, %c0_i32_0 : i32, i32
  }
  func.func @transform_2(%arg0: i32) -> (i32, i32) {
    %c0_i32 = arith.constant 0 : i32
    %c0_i32_0 = arith.constant 0 : i32
    %c0_i32_1 = arith.constant 0 : i32
    return %c0_i32, %c0_i32_0 : i32, i32
  }
  func.func @transform_3(%arg0: i32) -> (i32, i32) {
    %c0_i32 = arith.constant 0 : i32
    %c0_i32_0 = arith.constant 0 : i32
    %c0_i32_1 = arith.constant 0 : i32
    return %c0_i32, %c0_i32_0 : i32, i32
  }
  func.func @transform_4(%arg0: i32) -> (i32, i32) {
    %c0_i32 = arith.constant 0 : i32
    %c0_i32_0 = arith.constant 0 : i32
    %c0_i32_1 = arith.constant 0 : i32
    return %c0_i32, %c0_i32_0 : i32, i32
  }
  func.func @transform_5(%arg0: i32) -> (i32, i32) {
    %c0_i32 = arith.constant 0 : i32
    %c0_i32_0 = arith.constant 0 : i32
    %c0_i32_1 = arith.constant 0 : i32
    return %c0_i32, %c0_i32_0 : i32, i32
  }
  func.func @transform_6(%arg0: i32) -> (i32, i32) {
    %c0_i32 = arith.constant 0 : i32
    %c0_i32_0 = arith.constant 0 : i32
    %c0_i32_1 = arith.constant 0 : i32
    return %c0_i32, %c0_i32_0 : i32, i32
  }
  func.func @transform_7(%arg0: i32) -> (i32, i32) {
    %c0_i32 = arith.constant 0 : i32
    %c0_i32_0 = arith.constant 0 : i32
    return %c0_i32, %arg0 : i32, i32
  }
}

</mosaic_0001>

<bundles_post_ra>
// kernel: net_forward.3
= control target key start
LH: loop header
LB: loop body
LE: loop exit
PB: predicated region body
PF: predicated region fallthrough
CT: control target
= control target key end

     0   :  { %vm68_vm0 = vcmask 1042432   ;;  %v866_v3 = vmov 0.0   ;;  %vm64_vm1 = vcmask 613376   ;;  %s1443_s1 = inlined_call_operand.vmem [shape: f32[75,392], index: 1, kind: input, shape index: {}]   ;;  %s1444_s0 = inlined_call_operand.vmem [shape: f32[8,75], index: 0, kind: input, shape index: {}]   ;;  %s1445_s2 = inlined_call_operand.vmem [shape: f32[75,392], index: 2, kind: input, shape index: {}]   ;;  %s1446_s3 = inlined_call_operand.vmem [shape: f32[75,392], index: 3, kind: input, shape index: {}]   ;;  %s1447_s4 = inlined_call_operand.vmem [shape: f32[75,392], index: 4, kind: input, shape index: {}]   ;;  %s1448_s5 = inlined_call_operand.vmem [shape: f32[8,1], index: 5, kind: input, shape index: {}]   ;;  %s1449_s6 = inlined_call_operand.vmem [shape: f32[8,392], index: 6, kind: output, shape index: {}]  }
   0x1   :  { %v61_v0 = vld [vmem:[%s1443_s1 + $0x128] sm:$0x7]  ;;  %v63_v1 = vld [vmem:[%s1443_s1 + $0x138] sm:$0x7]  ;;  %v60_v2 = vld [vmem:[%s1443_s1 + $0x120] sm:$0x7]  ;;  %145 = vmatprep.mubr.f32.mxu0 %v866_v3  ;;  %216 = vmatprep.mubr.f32.mxu1 %v866_v3 }
   0x2   :  { %839 = vmatprep.subr.msk.mxu0 %vm68_vm0, %v61_v0  ;;  %842 = vmatprep.subr.msk.mxu1 %vm68_vm0, %v63_v1  ;;  %v62_v4 = vld [vmem:[%s1443_s1 + $0x130] sm:$0x7]  ;;  %v57_v5 = vld [vmem:[%s1443_s1 + $0x108] sm:$0xff]  ;;  %v59_v6 = vld [vmem:[%s1443_s1 + $0x118] sm:$0xff] }
   0x3   :  { %840 = vmatpush1.msk.msra.mxu0 %vm68_vm0, %v60_v2  ;;  %843 = vmatpush1.msk.msra.mxu1 %vm68_vm0, %v62_v4  ;;  %v56_v7 = vld [vmem:[%s1443_s1 + $0x100] sm:$0xff]  ;;  %v58_v8 = vld [vmem:[%s1443_s1 + $0x110] sm:$0xff]  ;;  %v53_v9 = vld [vmem:[%s1443_s1 + $0xe8] sm:$0xff] }
   0x4   :  { %95 = vmatprep.subr.mxu0 %v57_v5  ;;  %166 = vmatprep.subr.mxu1 %v59_v6  ;;  %v55_v10 = vld [vmem:[%s1443_s1 + $0xf8] sm:$0xff]  ;;  %v52_v11 = vld [vmem:[%s1443_s1 + $0xe0] sm:$0xff]  ;;  %v54_v12 = vld [vmem:[%s1443_s1 + $0xf0] sm:$0xff] }
   0x5   :  { %96 = vmatpush1.msra.mxu0 %v56_v7  ;;  %167 = vmatpush1.msra.mxu1 %v58_v8  ;;  %v49_v13 = vld [vmem:[%s1443_s1 + $0xc8] sm:$0xff]  ;;  %v51_v14 = vld [vmem:[%s1443_s1 + $0xd8] sm:$0xff]  ;;  %v48_v15 = vld [vmem:[%s1443_s1 + $0xc0] sm:$0xff] }
   0x6   :  { %97 = vmatprep.subr.mxu0 %v53_v9  ;;  %168 = vmatprep.subr.mxu1 %v55_v10  ;;  %v50_v16 = vld [vmem:[%s1443_s1 + $0xd0] sm:$0xff]  ;;  %v45_v17 = vld [vmem:[%s1443_s1 + $0xa8] sm:$0xff]  ;;  %v47_v18 = vld [vmem:[%s1443_s1 + $0xb8] sm:$0xff] }
   0x7   :  { %98 = vmatpush1.msra.mxu0 %v52_v11  ;;  %169 = vmatpush1.msra.mxu1 %v54_v12  ;;  %v44_v19 = vld [vmem:[%s1443_s1 + $0xa0] sm:$0xff]  ;;  %v46_v20 = vld [vmem:[%s1443_s1 + $0xb0] sm:$0xff]  ;;  %v41_v21 = vld [vmem:[%s1443_s1 + $0x88] sm:$0xff] }
   0x8   :  { %99 = vmatprep.subr.mxu0 %v49_v13  ;;  %170 = vmatprep.subr.mxu1 %v51_v14  ;;  %v43_v22 = vld [vmem:[%s1443_s1 + $0x98] sm:$0xff]  ;;  %v40_v23 = vld [vmem:[%s1443_s1 + $0x80] sm:$0xff]  ;;  %v42_v24 = vld [vmem:[%s1443_s1 + $0x90] sm:$0xff] }
   0x9   :  { %100 = vmatpush1.msra.mxu0 %v48_v15  ;;  %171 = vmatpush1.msra.mxu1 %v50_v16  ;;  %v37_v25 = vld [vmem:[%s1443_s1 + $0x68] sm:$0xff]  ;;  %v39_v26 = vld [vmem:[%s1443_s1 + $0x78] sm:$0xff]  ;;  %v36_v27 = vld [vmem:[%s1443_s1 + $0x60] sm:$0xff] }
   0xa   :  { %101 = vmatprep.subr.mxu0 %v45_v17  ;;  %172 = vmatprep.subr.mxu1 %v47_v18  ;;  %v38_v28 = vld [vmem:[%s1443_s1 + $0x70] sm:$0xff]  ;;  %v33_v29 = vld [vmem:[%s1443_s1 + $0x48] sm:$0xff]  ;;  %v35_v30 = vld [vmem:[%s1443_s1 + $0x58] sm:$0xff] }
   0xb   :  { %102 = vmatpush1.msra.mxu0 %v44_v19  ;;  %173 = vmatpush1.msra.mxu1 %v46_v20  ;;  %v32_v31 = vld [vmem:[%s1443_s1 + $0x40] sm:$0xff]  ;;  %v34_v32 = vld [vmem:[%s1443_s1 + $0x50] sm:$0xff]  ;;  %v29_v33 = vld [vmem:[%s1443_s1 + $0x28] sm:$0xff] }
   0xc   :  { %103 = vmatprep.subr.mxu0 %v41_v21  ;;  %174 = vmatprep.subr.mxu1 %v43_v22  ;;  %v31_v34 = vld [vmem:[%s1443_s1 + $0x38] sm:$0xff]  ;;  %v28_v35 = vld [vmem:[%s1443_s1 + $0x20] sm:$0xff]  ;;  %v30_v36 = vld [vmem:[%s1443_s1 + $0x30] sm:$0xff] }
   0xd   :  { %104 = vmatpush1.msra.mxu0 %v40_v23  ;;  %175 = vmatpush1.msra.mxu1 %v42_v24  ;;  %v25_v37 = vld [vmem:[%s1443_s1 + $0x8] sm:$0xff]  ;;  %v27_v38 = vld [vmem:[%s1443_s1 + $0x18] sm:$0xff]  ;;  %v24_v39 = vld [vmem:[%s1443_s1] sm:$0xff] }
   0xe   :  { %105 = vmatprep.subr.mxu0 %v37_v25  ;;  %176 = vmatprep.subr.mxu1 %v39_v26  ;;  %v26_v40 = vld [vmem:[%s1443_s1 + $0x10] sm:$0xff]  ;;  %v1032_v41 = vld [vmem:[%s1444_s0] sm:$0xff]  ;;  %v260_v42 = vld [vmem:[%s1445_s2 + $0x128] sm:$0x7] }
   0xf   :  { %106 = vmatpush1.msra.mxu0 %v36_v27  ;;  %177 = vmatpush1.msra.mxu1 %v38_v28  ;;  %v262_v43 = vld [vmem:[%s1445_s2 + $0x138] sm:$0x7]  ;;  %v259_v44 = vld [vmem:[%s1445_s2 + $0x120] sm:$0x7]  ;;  %v261_v45 = vld [vmem:[%s1445_s2 + $0x130] sm:$0x7] }
  0x10   :  { %107 = vmatprep.subr.mxu0 %v33_v29  ;;  %178 = vmatprep.subr.mxu1 %v35_v30  ;;  %v256_v46 = vld [vmem:[%s1445_s2 + $0x108] sm:$0xff]  ;;  %v258_v47 = vld [vmem:[%s1445_s2 + $0x118] sm:$0xff]  ;;  %v255_v48 = vld [vmem:[%s1445_s2 + $0x100] sm:$0xff] }
  0x11   :  { %108 = vmatpush1.msra.mxu0 %v32_v31  ;;  %179 = vmatpush1.msra.mxu1 %v34_v32  ;;  %v257_v49 = vld [vmem:[%s1445_s2 + $0x110] sm:$0xff]  ;;  %v252_v50 = vld [vmem:[%s1445_s2 + $0xe8] sm:$0xff]  ;;  %v254_v51 = vld [vmem:[%s1445_s2 + $0xf8] sm:$0xff] }
  0x12   :  { %109 = vmatprep.subr.mxu0 %v29_v33  ;;  %180 = vmatprep.subr.mxu1 %v31_v34  ;;  %v251_v52 = vld [vmem:[%s1445_s2 + $0xe0] sm:$0xff]  ;;  %v253_v53 = vld [vmem:[%s1445_s2 + $0xf0] sm:$0xff]  ;;  %v248_v54 = vld [vmem:[%s1445_s2 + $0xc8] sm:$0xff] }
  0x13   :  { %110 = vmatpush1.msra.mxu0 %v28_v35  ;;  %181 = vmatpush1.msra.mxu1 %v30_v36  ;;  %v250_v55 = vld [vmem:[%s1445_s2 + $0xd8] sm:$0xff]  ;;  %v247_v56 = vld [vmem:[%s1445_s2 + $0xc0] sm:$0xff]  ;;  %v249_v57 = vld [vmem:[%s1445_s2 + $0xd0] sm:$0xff] }
  0x14   :  { %111 = vmatprep.subr.mxu0 %v25_v37  ;;  %182 = vmatprep.subr.mxu1 %v27_v38  ;;  %v244_v58 = vld [vmem:[%s1445_s2 + $0xa8] sm:$0xff]  ;;  %v246_v59 = vld [vmem:[%s1445_s2 + $0xb8] sm:$0xff]  ;;  %v243_v60 = vld [vmem:[%s1445_s2 + $0xa0] sm:$0xff] }
  0x15   :  { %112 = vmatpush1.msra.mxu0 %v24_v39  ;;  %183 = vmatpush1.msra.mxu1 %v26_v40  ;;  %v245_v61 = vld [vmem:[%s1445_s2 + $0xb0] sm:$0xff]  ;;  %v240_v62 = vld [vmem:[%s1445_s2 + $0x88] sm:$0xff]  ;;  %v242_v63 = vld [vmem:[%s1445_s2 + $0x98] sm:$0xff] }
  0x16   :  { %841 = vmatmul.mubr.msk.f32.vlgmr.msra.gmra.mxu0 %vm64_vm1, %v1032_v41  ;;  %844 = vmatmul.mubr.msk.f32.vlgmr.msra.gmra.mxu1 %vm64_vm1, %v1032_v41  ;;  %v239_v0 = vld [vmem:[%s1445_s2 + $0x80] sm:$0xff]  ;;  %v241_v1 = vld [vmem:[%s1445_s2 + $0x90] sm:$0xff]  ;;  %v236_v2 = vld [vmem:[%s1445_s2 + $0x68] sm:$0xff] }
  0x17   :  { %845 = vmatprep.subr.msk.mxu0 %vm68_vm0, %v260_v42  ;;  %848 = vmatprep.subr.msk.mxu1 %vm68_vm0, %v262_v43  ;;  %v238_v4 = vld [vmem:[%s1445_s2 + $0x78] sm:$0xff]  ;;  %v235_v5 = vld [vmem:[%s1445_s2 + $0x60] sm:$0xff]  ;;  %v237_v6 = vld [vmem:[%s1445_s2 + $0x70] sm:$0xff] }
  0x18   :  { %846 = vmatpush1.msk.msra.mxu0 %vm68_vm0, %v259_v44  ;;  %849 = vmatpush1.msk.msra.mxu1 %vm68_vm0, %v261_v45  ;;  %v232_v7 = vld [vmem:[%s1445_s2 + $0x48] sm:$0xff]  ;;  %v234_v8 = vld [vmem:[%s1445_s2 + $0x58] sm:$0xff]  ;;  %v231_v9 = vld [vmem:[%s1445_s2 + $0x40] sm:$0xff] }
  0x19   :  { %289 = vmatprep.subr.mxu0 %v256_v46  ;;  %360 = vmatprep.subr.mxu1 %v258_v47  ;;  %v233_v10 = vld [vmem:[%s1445_s2 + $0x50] sm:$0xff]  ;;  %v228_v11 = vld [vmem:[%s1445_s2 + $0x28] sm:$0xff]  ;;  %v230_v12 = vld [vmem:[%s1445_s2 + $0x38] sm:$0xff] }
  0x1a   :  { %290 = vmatpush1.msra.mxu0 %v255_v48  ;;  %361 = vmatpush1.msra.mxu1 %v257_v49  ;;  %v227_v13 = vld [vmem:[%s1445_s2 + $0x20] sm:$0xff]  ;;  %v229_v14 = vld [vmem:[%s1445_s2 + $0x30] sm:$0xff]  ;;  %v224_v15 = vld [vmem:[%s1445_s2 + $0x8] sm:$0xff] }
  0x1b   :  { %291 = vmatprep.subr.mxu0 %v252_v50  ;;  %362 = vmatprep.subr.mxu1 %v254_v51  ;;  %v226_v16 = vld [vmem:[%s1445_s2 + $0x18] sm:$0xff]  ;;  %v223_v17 = vld [vmem:[%s1445_s2] sm:$0xff]  ;;  %v225_v18 = vld [vmem:[%s1445_s2 + $0x10] sm:$0xff] }
  0x1c   :  { %292 = vmatpush1.msra.mxu0 %v251_v52  ;;  %363 = vmatpush1.msra.mxu1 %v253_v53  ;;  %v458_v19 = vld [vmem:[%s1446_s3 + $0x128] sm:$0x7]  ;;  %v460_v20 = vld [vmem:[%s1446_s3 + $0x138] sm:$0x7]  ;;  %v457_v21 = vld [vmem:[%s1446_s3 + $0x120] sm:$0x7] }
  0x1d   :  { %293 = vmatprep.subr.mxu0 %v248_v54  ;;  %364 = vmatprep.subr.mxu1 %v250_v55  ;;  %v459_v22 = vld [vmem:[%s1446_s3 + $0x130] sm:$0x7]  ;;  %v454_v23 = vld [vmem:[%s1446_s3 + $0x108] sm:$0xff]  ;;  %v456_v24 = vld [vmem:[%s1446_s3 + $0x118] sm:$0xff] }
  0x1e   :  { %294 = vmatpush1.msra.mxu0 %v247_v56  ;;  %365 = vmatpush1.msra.mxu1 %v249_v57  ;;  %v453_v25 = vld [vmem:[%s1446_s3 + $0x100] sm:$0xff]  ;;  %v455_v26 = vld [vmem:[%s1446_s3 + $0x110] sm:$0xff]  ;;  %v450_v27 = vld [vmem:[%s1446_s3 + $0xe8] sm:$0xff] }
  0x1f   :  { %295 = vmatprep.subr.mxu0 %v244_v58  ;;  %366 = vmatprep.subr.mxu1 %v246_v59  ;;  %v452_v28 = vld [vmem:[%s1446_s3 + $0xf8] sm:$0xff]  ;;  %v449_v29 = vld [vmem:[%s1446_s3 + $0xe0] sm:$0xff]  ;;  %v451_v30 = vld [vmem:[%s1446_s3 + $0xf0] sm:$0xff] }
  0x20   :  { %296 = vmatpush1.msra.mxu0 %v243_v60  ;;  %367 = vmatpush1.msra.mxu1 %v245_v61  ;;  %v446_v31 = vld [vmem:[%s1446_s3 + $0xc8] sm:$0xff]  ;;  %v448_v32 = vld [vmem:[%s1446_s3 + $0xd8] sm:$0xff]  ;;  %v445_v33 = vld [vmem:[%s1446_s3 + $0xc0] sm:$0xff] }
  0x21   :  { %297 = vmatprep.subr.mxu0 %v240_v62  ;;  %368 = vmatprep.subr.mxu1 %v242_v63  ;;  %v447_v34 = vld [vmem:[%s1446_s3 + $0xd0] sm:$0xff]  ;;  %v442_v35 = vld [vmem:[%s1446_s3 + $0xa8] sm:$0xff]  ;;  %v444_v36 = vld [vmem:[%s1446_s3 + $0xb8] sm:$0xff] }
  0x22   :  { %298 = vmatpush1.msra.mxu0 %v239_v0  ;;  %369 = vmatpush1.msra.mxu1 %v241_v1  ;;  %v441_v37 = vld [vmem:[%s1446_s3 + $0xa0] sm:$0xff]  ;;  %v443_v38 = vld [vmem:[%s1446_s3 + $0xb0] sm:$0xff]  ;;  %v438_v39 = vld [vmem:[%s1446_s3 + $0x88] sm:$0xff] }
  0x23   :  { %299 = vmatprep.subr.mxu0 %v236_v2  ;;  %370 = vmatprep.subr.mxu1 %v238_v4  ;;  %v440_v40 = vld [vmem:[%s1446_s3 + $0x98] sm:$0xff]  ;;  %v437_v42 = vld [vmem:[%s1446_s3 + $0x80] sm:$0xff]  ;;  %v439_v43 = vld [vmem:[%s1446_s3 + $0x90] sm:$0xff] }
  0x24   :  { %300 = vmatpush1.msra.mxu0 %v235_v5  ;;  %371 = vmatpush1.msra.mxu1 %v237_v6  ;;  %v434_v44 = vld [vmem:[%s1446_s3 + $0x68] sm:$0xff]  ;;  %v436_v45 = vld [vmem:[%s1446_s3 + $0x78] sm:$0xff]  ;;  %v433_v46 = vld [vmem:[%s1446_s3 + $0x60] sm:$0xff] }
  0x25   :  { %301 = vmatprep.subr.mxu0 %v232_v7  ;;  %372 = vmatprep.subr.mxu1 %v234_v8  ;;  %v435_v47 = vld [vmem:[%s1446_s3 + $0x70] sm:$0xff]  ;;  %v430_v48 = vld [vmem:[%s1446_s3 + $0x48] sm:$0xff]  ;;  %v432_v49 = vld [vmem:[%s1446_s3 + $0x58] sm:$0xff] }
  0x26   :  { %302 = vmatpush1.msra.mxu0 %v231_v9  ;;  %373 = vmatpush1.msra.mxu1 %v233_v10  ;;  %v429_v50 = vld [vmem:[%s1446_s3 + $0x40] sm:$0xff]  ;;  %v431_v51 = vld [vmem:[%s1446_s3 + $0x50] sm:$0xff]  ;;  %v426_v52 = vld [vmem:[%s1446_s3 + $0x28] sm:$0xff] }
  0x27   :  { %303 = vmatprep.subr.mxu0 %v228_v11  ;;  %374 = vmatprep.subr.mxu1 %v230_v12  ;;  %v428_v53 = vld [vmem:[%s1446_s3 + $0x38] sm:$0xff]  ;;  %v425_v54 = vld [vmem:[%s1446_s3 + $0x20] sm:$0xff]  ;;  %v427_v55 = vld [vmem:[%s1446_s3 + $0x30] sm:$0xff] }
  0x28   :  { %304 = vmatpush1.msra.mxu0 %v227_v13  ;;  %375 = vmatpush1.msra.mxu1 %v229_v14  ;;  %v422_v56 = vld [vmem:[%s1446_s3 + $0x8] sm:$0xff]  ;;  %v424_v57 = vld [vmem:[%s1446_s3 + $0x18] sm:$0xff]  ;;  %v421_v58 = vld [vmem:[%s1446_s3] sm:$0xff] }
  0x29   :  { %305 = vmatprep.subr.mxu0 %v224_v15  ;;  %376 = vmatprep.subr.mxu1 %v226_v16  ;;  %v423_v59 = vld [vmem:[%s1446_s3 + $0x10] sm:$0xff]  ;;  %v656_v60 = vld [vmem:[%s1447_s4 + $0x128] sm:$0x7]  ;;  %v658_v61 = vld [vmem:[%s1447_s4 + $0x138] sm:$0x7] }
  0x2a   :  { %306 = vmatpush1.msra.mxu0 %v223_v17  ;;  %339 = vmatprep.mubr.f32.mxu0 %v866_v3  ;;  %v655_v62 = vld [vmem:[%s1447_s4 + $0x120] sm:$0x7]  ;;  %v657_v63 = vld [vmem:[%s1447_s4 + $0x130] sm:$0x7]  ;;  %v652_v0 = vld [vmem:[%s1447_s4 + $0x108] sm:$0xff] }
  0x2b   :  { %377 = vmatpush1.msra.mxu1 %v225_v18  ;;  %410 = vmatprep.mubr.f32.mxu1 %v866_v3  ;;  %v654_v1 = vld [vmem:[%s1447_s4 + $0x118] sm:$0xff]  ;;  %v651_v2 = vld [vmem:[%s1447_s4 + $0x100] sm:$0xff]  ;;  %v653_v4 = vld [vmem:[%s1447_s4 + $0x110] sm:$0xff] }
  0x2c   :  { %847 = vmatmul.mubr.msk.f32.vlgmr.msra.gmra.mxu0 %vm64_vm1, %v1032_v41  ;;  %850 = vmatmul.mubr.msk.f32.vlgmr.msra.gmra.mxu1 %vm64_vm1, %v1032_v41  ;;  %v648_v5 = vld [vmem:[%s1447_s4 + $0xe8] sm:$0xff]  ;;  %v650_v6 = vld [vmem:[%s1447_s4 + $0xf8] sm:$0xff]  ;;  %v647_v7 = vld [vmem:[%s1447_s4 + $0xe0] sm:$0xff] }
  0x2d   :  { %851 = vmatprep.subr.msk.mxu0 %vm68_vm0, %v458_v19  ;;  %854 = vmatprep.subr.msk.mxu1 %vm68_vm0, %v460_v20  ;;  %v649_v8 = vld [vmem:[%s1447_s4 + $0xf0] sm:$0xff]  ;;  %v644_v9 = vld [vmem:[%s1447_s4 + $0xc8] sm:$0xff]  ;;  %v646_v10 = vld [vmem:[%s1447_s4 + $0xd8] sm:$0xff] }
  0x2e   :  { %852 = vmatpush1.msk.msra.mxu0 %vm68_vm0, %v457_v21  ;;  %855 = vmatpush1.msk.msra.mxu1 %vm68_vm0, %v459_v22  ;;  %v643_v11 = vld [vmem:[%s1447_s4 + $0xc0] sm:$0xff]  ;;  %v645_v12 = vld [vmem:[%s1447_s4 + $0xd0] sm:$0xff]  ;;  %v640_v13 = vld [vmem:[%s1447_s4 + $0xa8] sm:$0xff] }
  0x2f   :  { %487 = vmatprep.subr.mxu0 %v454_v23  ;;  %558 = vmatprep.subr.mxu1 %v456_v24  ;;  %v642_v14 = vld [vmem:[%s1447_s4 + $0xb8] sm:$0xff]  ;;  %v639_v15 = vld [vmem:[%s1447_s4 + $0xa0] sm:$0xff]  ;;  %v641_v16 = vld [vmem:[%s1447_s4 + $0xb0] sm:$0xff] }
  0x30   :  { %488 = vmatpush1.msra.mxu0 %v453_v25  ;;  %559 = vmatpush1.msra.mxu1 %v455_v26  ;;  %v636_v17 = vld [vmem:[%s1447_s4 + $0x88] sm:$0xff]  ;;  %v638_v18 = vld [vmem:[%s1447_s4 + $0x98] sm:$0xff]  ;;  %v635_v19 = vld [vmem:[%s1447_s4 + $0x80] sm:$0xff] }
  0x31   :  { %489 = vmatprep.subr.mxu0 %v450_v27  ;;  %560 = vmatprep.subr.mxu1 %v452_v28  ;;  %v637_v20 = vld [vmem:[%s1447_s4 + $0x90] sm:$0xff]  ;;  %v632_v21 = vld [vmem:[%s1447_s4 + $0x68] sm:$0xff]  ;;  %v634_v22 = vld [vmem:[%s1447_s4 + $0x78] sm:$0xff] }
  0x32   :  { %490 = vmatpush1.msra.mxu0 %v449_v29  ;;  %561 = vmatpush1.msra.mxu1 %v451_v30  ;;  %v631_v23 = vld [vmem:[%s1447_s4 + $0x60] sm:$0xff]  ;;  %v633_v24 = vld [vmem:[%s1447_s4 + $0x70] sm:$0xff]  ;;  %v628_v25 = vld [vmem:[%s1447_s4 + $0x48] sm:$0xff] }
  0x33   :  { %491 = vmatprep.subr.mxu0 %v446_v31  ;;  %562 = vmatprep.subr.mxu1 %v448_v32  ;;  %v630_v26 = vld [vmem:[%s1447_s4 + $0x58] sm:$0xff]  ;;  %v627_v27 = vld [vmem:[%s1447_s4 + $0x40] sm:$0xff]  ;;  %v629_v28 = vld [vmem:[%s1447_s4 + $0x50] sm:$0xff] }
  0x34   :  { %492 = vmatpush1.msra.mxu0 %v445_v33  ;;  %563 = vmatpush1.msra.mxu1 %v447_v34  ;;  %v624_v29 = vld [vmem:[%s1447_s4 + $0x28] sm:$0xff]  ;;  %v626_v30 = vld [vmem:[%s1447_s4 + $0x38] sm:$0xff]  ;;  %v623_v31 = vld [vmem:[%s1447_s4 + $0x20] sm:$0xff] }
  0x35   :  { %493 = vmatprep.subr.mxu0 %v442_v35  ;;  %564 = vmatprep.subr.mxu1 %v444_v36  ;;  %v625_v32 = vld [vmem:[%s1447_s4 + $0x30] sm:$0xff]  ;;  %v620_v33 = vld [vmem:[%s1447_s4 + $0x8] sm:$0xff]  ;;  %v622_v34 = vld [vmem:[%s1447_s4 + $0x18] sm:$0xff] }
  0x36   :  { %494 = vmatpush1.msra.mxu0 %v441_v37  ;;  %565 = vmatpush1.msra.mxu1 %v443_v38  ;;  %v619_v35 = vld [vmem:[%s1447_s4] sm:$0xff]  ;;  %v621_v36 = vld [vmem:[%s1447_s4 + $0x10] sm:$0xff]  ;;  %v867_v38 = vmov 0  }
  0x37   :  { %495 = vmatprep.subr.mxu0 %v438_v39  ;;  %566 = vmatprep.subr.mxu1 %v440_v40  ;;  %v817_v37 = vld [vmem:[%s1448_s5] sm:$0xff] }
  0x38   :  { %496 = vmatpush1.msra.mxu0 %v437_v42  ;;  %567 = vmatpush1.msra.mxu1 %v439_v43 }
  0x39   :  { %497 = vmatprep.subr.mxu0 %v434_v44  ;;  %568 = vmatprep.subr.mxu1 %v436_v45 }
  0x3a   :  { %498 = vmatpush1.msra.mxu0 %v433_v46  ;;  %569 = vmatpush1.msra.mxu1 %v435_v47 }
  0x3b   :  { %499 = vmatprep.subr.mxu0 %v430_v48  ;;  %570 = vmatprep.subr.mxu1 %v432_v49 }
  0x3c   :  { %500 = vmatpush1.msra.mxu0 %v429_v50  ;;  %571 = vmatpush1.msra.mxu1 %v431_v51 }
  0x3d   :  { %501 = vmatprep.subr.mxu0 %v426_v52  ;;  %572 = vmatprep.subr.mxu1 %v428_v53 }
  0x3e   :  { %502 = vmatpush1.msra.mxu0 %v425_v54  ;;  %573 = vmatpush1.msra.mxu1 %v427_v55 }
  0x3f   :  { %503 = vmatprep.subr.mxu0 %v422_v56  ;;  %574 = vmatprep.subr.mxu1 %v424_v57 }
  0x40   :  { %504 = vmatpush1.msra.mxu0 %v421_v58  ;;  %537 = vmatprep.mubr.f32.mxu0 %v866_v3 }
  0x41   :  { %575 = vmatpush1.msra.mxu1 %v423_v59  ;;  %608 = vmatprep.mubr.f32.mxu1 %v866_v3 }
  0x42   :  { %853 = vmatmul.mubr.msk.f32.vlgmr.msra.gmra.mxu0 %vm64_vm1, %v1032_v41  ;;  %856 = vmatmul.mubr.msk.f32.vlgmr.msra.gmra.mxu1 %vm64_vm1, %v1032_v41 }
  0x43   :  { %857 = vmatprep.subr.msk.mxu0 %vm68_vm0, %v656_v60  ;;  %860 = vmatprep.subr.msk.mxu1 %vm68_vm0, %v658_v61 }
  0x44   :  { %858 = vmatpush1.msk.msra.mxu0 %vm68_vm0, %v655_v62  ;;  %861 = vmatpush1.msk.msra.mxu1 %vm68_vm0, %v657_v63 }
  0x45   :  { %685 = vmatprep.subr.mxu0 %v652_v0  ;;  %756 = vmatprep.subr.mxu1 %v654_v1 }
  0x46   :  { %686 = vmatpush1.msra.mxu0 %v651_v2  ;;  %757 = vmatpush1.msra.mxu1 %v653_v4 }
  0x47   :  { %687 = vmatprep.subr.mxu0 %v648_v5  ;;  %758 = vmatprep.subr.mxu1 %v650_v6 }
  0x48   :  { %688 = vmatpush1.msra.mxu0 %v647_v7  ;;  %759 = vmatpush1.msra.mxu1 %v649_v8 }
  0x49   :  { %689 = vmatprep.subr.mxu0 %v644_v9  ;;  %760 = vmatprep.subr.mxu1 %v646_v10 }
  0x4a   :  { %690 = vmatpush1.msra.mxu0 %v643_v11  ;;  %761 = vmatpush1.msra.mxu1 %v645_v12 }
  0x4b   :  { %691 = vmatprep.subr.mxu0 %v640_v13  ;;  %762 = vmatprep.subr.mxu1 %v642_v14 }
  0x4c   :  { %692 = vmatpush1.msra.mxu0 %v639_v15  ;;  %763 = vmatpush1.msra.mxu1 %v641_v16 }
  0x4d   :  { %693 = vmatprep.subr.mxu0 %v636_v17  ;;  %764 = vmatprep.subr.mxu1 %v638_v18 }
  0x4e   :  { %694 = vmatpush1.msra.mxu0 %v635_v19  ;;  %765 = vmatpush1.msra.mxu1 %v637_v20 }
  0x4f   :  { %695 = vmatprep.subr.mxu0 %v632_v21  ;;  %766 = vmatprep.subr.mxu1 %v634_v22 }
  0x50   :  { %696 = vmatpush1.msra.mxu0 %v631_v23  ;;  %767 = vmatpush1.msra.mxu1 %v633_v24 }
  0x51   :  { %697 = vmatprep.subr.mxu0 %v628_v25  ;;  %768 = vmatprep.subr.mxu1 %v630_v26 }
  0x52   :  { %698 = vmatpush1.msra.mxu0 %v627_v27  ;;  %769 = vmatpush1.msra.mxu1 %v629_v28 }
  0x53   :  { %699 = vmatprep.subr.mxu0 %v624_v29  ;;  %770 = vmatprep.subr.mxu1 %v626_v30 }
  0x54   :  { %700 = vmatpush1.msra.mxu0 %v623_v31  ;;  %771 = vmatpush1.msra.mxu1 %v625_v32 }
  0x55   :  { %701 = vmatprep.subr.mxu0 %v620_v33  ;;  %772 = vmatprep.subr.mxu1 %v622_v34 }
  0x56   :  { %702 = vmatpush1.msra.mxu0 %v619_v35  ;;  %735 = vmatprep.mubr.f32.mxu0 %v866_v3 }
  0x57   :  { %773 = vmatpush1.msra.mxu1 %v621_v36  ;;  %806 = vmatprep.mubr.f32.mxu1 %v866_v3 }
  0x58   :  { %859 = vmatmul.mubr.msk.f32.vlgmr.msra.gmra.mxu0 %vm64_vm1, %v1032_v41  ;;  %862 = vmatmul.mubr.msk.f32.vlgmr.msra.gmra.mxu1 %vm64_vm1, %v1032_v41 }
  0x59   :  { %865 = vset.pattern.permute.xlu0 %v867_v38 }
  0x5a   :  { %820 = vperm.xlu0 %865, %v817_v37  }
  0xd5   :  { %v821_v56 = vpop.permute.xlu0 %820 }
  0xd6   :  { %v147_v39 = vpop.f32.mrf.mxu0  ;;  %v218_v40 = vpop.f32.mrf.mxu1 }
  0xd8   :  { %v149_v42 = vpop.f32.mrf.mxu0  ;;  %v220_v43 = vpop.f32.mrf.mxu1 }
  0xec   :  { %v341_v44 = vpop.f32.mrf.mxu0  ;;  %v412_v45 = vpop.f32.mrf.mxu1 }
  0xed   :  { %v417_v49 = vmax.f32 %v147_v39, %v341_v44  ;;  %v419_v50 = vmax.f32 %v218_v40, %v412_v45 }
  0xee   :  { %v343_v3 = vpop.f32.mrf.mxu0  ;;  %v414_v46 = vpop.f32.mrf.mxu1 }
  0xef   :  { %v418_v53 = vmax.f32 %v149_v42, %v343_v3  ;;  %v420_v54 = vmax.f32 %v220_v43, %v414_v46 }
 0x102   :  { %v539_v47 = vpop.f32.mrf.mxu0  ;;  %v610_v48 = vpop.f32.mrf.mxu1 }
 0x103   :  { %v615_v41 = vmax.f32 %v417_v49, %v539_v47  ;;  %v617_v55 = vmax.f32 %v419_v50, %v610_v48 }
 0x104   :  { %v541_v51 = vpop.f32.mrf.mxu0  ;;  %v612_v52 = vpop.f32.mrf.mxu1 }
 0x105   :  { %v616_v59 = vmax.f32 %v418_v53, %v541_v51  ;;  %v618_v60 = vmax.f32 %v420_v54, %v612_v52 }
 0x118   :  { %v737_v57 = vpop.f32.mrf.mxu0  ;;  %v808_v58 = vpop.f32.mrf.mxu1 }
 0x119   :  { %v813_v61 = vmax.f32 %v615_v41, %v737_v57  ;;  %v815_v62 = vmax.f32 %v617_v55, %v808_v58 }
 0x11a   :  { %v739_v63 = vpop.f32.mrf.mxu0  ;;  %v810_v0 = vpop.f32.mrf.mxu1 }
 0x11b   :  { %v823_v1 = vadd.f32 %v821_v56, %v813_v61  ;;  %v825_v2 = vadd.f32 %v821_v56, %v815_v62  ;;  %v814_v4 = vmax.f32 %v616_v59, %v739_v63  ;;  %v816_v5 = vmax.f32 %v618_v60, %v810_v0 }
 0x11d   :  { %v827_v6 = vmax.f32 %v823_v1, 0.0  ;;  %v829_v7 = vmax.f32 %v825_v2, 0.0  ;;  %v824_v8 = vadd.f32 %v821_v56, %v814_v4  ;;  %v826_v9 = vadd.f32 %v821_v56, %v816_v5 }
 0x11f   :  { %831 = vst [vmem:[%s1449_s6] sm:$0xff] %v827_v6  ;;  %833 = vst [vmem:[%s1449_s6 + $0x10] sm:$0xff] %v829_v7  ;;  %v828_v10 = vmax.f32 %v824_v8, 0.0  ;;  %v830_v11 = vmax.f32 %v826_v9, 0.0 }
 0x121   :  { %832 = vst [vmem:[%s1449_s6 + $0x8] sm:$0xff] %v828_v10  ;;  %834 = vst [vmem:[%s1449_s6 + $0x18] sm:$0xff] %v830_v11 }

// kernel: net_forward.4
= control target key start
LH: loop header
LB: loop body
LE: loop exit
PB: predicated region body
PF: predicated region fallthrough
CT: control target
= control target key end

     0   :  { %v473_v0 = vmov 0.0   ;;  %vm52_vm0 = vcmask 588800   ;;  %s954_s1 = inlined_call_operand.vmem [shape: f32[200,50], index: 1, kind: input, shape index: {}]   ;;  %s955_s2 = inlined_call_operand.vmem [shape: f32[200,50], index: 2, kind: input, shape index: {}]   ;;  %s956_s0 = inlined_call_operand.vmem [shape: f32[16,200], index: 0, kind: input, shape index: {}]   ;;  %s957_s3 = inlined_call_operand.vmem [shape: f32[200,50], index: 3, kind: input, shape index: {}]   ;;  %s958_s4 = inlined_call_operand.vmem [shape: f32[200,50], index: 4, kind: input, shape index: {}]   ;;  %s959_s5 = inlined_call_operand.vmem [shape: f32[16,1], index: 5, kind: input, shape index: {}]   ;;  %s960_s6 = inlined_call_operand.vmem [shape: f32[16,50], index: 6, kind: output, shape index: {}]  }
   0x1   :  { %59 = vmatprep.subr.mxu0 %v473_v0  ;;  %159 = vmatprep.subr.mxu1 %v473_v0  ;;  %v42_v1 = vld [vmem:[%s954_s1 + $0x78] sm:$0xff]  ;;  %v41_v3 = vld [vmem:[%s954_s1 + $0x70] sm:$0xff]  ;;  %v40_v5 = vld [vmem:[%s954_s1 + $0x68] sm:$0xff] }
   0x2   :  { %v149_v2 = vld [vmem:[%s955_s2 + $0x78] sm:$0xff]  ;;  %60 = vmatpush1.msra.mxu0 %v42_v1  ;;  %v148_v4 = vld [vmem:[%s955_s2 + $0x70] sm:$0xff]  ;;  %v147_v6 = vld [vmem:[%s955_s2 + $0x68] sm:$0xff] }
   0x3   :  { %160 = vmatpush1.msra.mxu1 %v149_v2  ;;  %61 = vmatprep.subr.mxu0 %v473_v0  ;;  %v39_v7 = vld [vmem:[%s954_s1 + $0x60] sm:$0xff]  ;;  %v38_v9 = vld [vmem:[%s954_s1 + $0x58] sm:$0xff]  ;;  %v37_v11 = vld [vmem:[%s954_s1 + $0x50] sm:$0xff] }
   0x4   :  { %161 = vmatprep.subr.mxu1 %v473_v0  ;;  %62 = vmatpush1.msra.mxu0 %v41_v3  ;;  %v146_v8 = vld [vmem:[%s955_s2 + $0x60] sm:$0xff]  ;;  %v145_v10 = vld [vmem:[%s955_s2 + $0x58] sm:$0xff]  ;;  %v144_v12 = vld [vmem:[%s955_s2 + $0x50] sm:$0xff] }
   0x5   :  { %162 = vmatpush1.msra.mxu1 %v148_v4  ;;  %63 = vmatprep.subr.mxu0 %v473_v0  ;;  %v36_v13 = vld [vmem:[%s954_s1 + $0x48] sm:$0xff]  ;;  %v35_v15 = vld [vmem:[%s954_s1 + $0x40] sm:$0xff]  ;;  %v34_v17 = vld [vmem:[%s954_s1 + $0x38] sm:$0xff] }
   0x6   :  { %163 = vmatprep.subr.mxu1 %v473_v0  ;;  %64 = vmatpush1.msra.mxu0 %v40_v5  ;;  %v143_v14 = vld [vmem:[%s955_s2 + $0x48] sm:$0xff]  ;;  %v142_v16 = vld [vmem:[%s955_s2 + $0x40] sm:$0xff]  ;;  %v141_v18 = vld [vmem:[%s955_s2 + $0x38] sm:$0xff] }
   0x7   :  { %164 = vmatpush1.msra.mxu1 %v147_v6  ;;  %65 = vmatprep.subr.mxu0 %v473_v0  ;;  %v33_v19 = vld [vmem:[%s954_s1 + $0x30] sm:$0xff]  ;;  %v32_v21 = vld [vmem:[%s954_s1 + $0x28] sm:$0xff]  ;;  %v31_v23 = vld [vmem:[%s954_s1 + $0x20] sm:$0xff] }
   0x8   :  { %165 = vmatprep.subr.mxu1 %v473_v0  ;;  %66 = vmatpush1.msra.mxu0 %v39_v7  ;;  %v140_v20 = vld [vmem:[%s955_s2 + $0x30] sm:$0xff]  ;;  %v139_v22 = vld [vmem:[%s955_s2 + $0x28] sm:$0xff]  ;;  %v138_v24 = vld [vmem:[%s955_s2 + $0x20] sm:$0xff] }
   0x9   :  { %166 = vmatpush1.msra.mxu1 %v146_v8  ;;  %67 = vmatprep.subr.mxu0 %v473_v0  ;;  %v30_v25 = vld [vmem:[%s954_s1 + $0x18] sm:$0xff]  ;;  %v29_v27 = vld [vmem:[%s954_s1 + $0x10] sm:$0xff]  ;;  %v28_v29 = vld [vmem:[%s954_s1 + $0x8] sm:$0xff] }
   0xa   :  { %167 = vmatprep.subr.mxu1 %v473_v0  ;;  %68 = vmatpush1.msra.mxu0 %v38_v9  ;;  %v137_v26 = vld [vmem:[%s955_s2 + $0x18] sm:$0xff]  ;;  %v136_v28 = vld [vmem:[%s955_s2 + $0x10] sm:$0xff]  ;;  %v135_v30 = vld [vmem:[%s955_s2 + $0x8] sm:$0xff] }
   0xb   :  { %168 = vmatpush1.msra.mxu1 %v145_v10  ;;  %69 = vmatprep.subr.mxu0 %v473_v0  ;;  %v27_v31 = vld [vmem:[%s954_s1] sm:$0xff]  ;;  %v50_v35 = vld [vmem:[%s954_s1 + $0xb8] sm:$0xff]  ;;  %v49_v37 = vld [vmem:[%s954_s1 + $0xb0] sm:$0xff] }
   0xc   :  { %169 = vmatprep.subr.mxu1 %v473_v0  ;;  %70 = vmatpush1.msra.mxu0 %v37_v11  ;;  %v134_v32 = vld [vmem:[%s955_s2] sm:$0xff]  ;;  %v157_v36 = vld [vmem:[%s955_s2 + $0xb8] sm:$0xff]  ;;  %v156_v38 = vld [vmem:[%s955_s2 + $0xb0] sm:$0xff] }
   0xd   :  { %170 = vmatpush1.msra.mxu1 %v144_v12  ;;  %71 = vmatprep.subr.mxu0 %v473_v0  ;;  %v51_v33 = vld [vmem:[%s954_s1 + $0xc0] sm:$0xff]  ;;  %v48_v39 = vld [vmem:[%s954_s1 + $0xa8] sm:$0xff]  ;;  %v46_v43 = vld [vmem:[%s954_s1 + $0x98] sm:$0xff] }
   0xe   :  { %171 = vmatprep.subr.mxu1 %v473_v0  ;;  %72 = vmatpush1.msra.mxu0 %v36_v13  ;;  %v158_v34 = vld [vmem:[%s955_s2 + $0xc0] sm:$0xff]  ;;  %v155_v40 = vld [vmem:[%s955_s2 + $0xa8] sm:$0xff]  ;;  %v153_v44 = vld [vmem:[%s955_s2 + $0x98] sm:$0xff] }
   0xf   :  { %172 = vmatpush1.msra.mxu1 %v143_v14  ;;  %73 = vmatprep.subr.mxu0 %v473_v0  ;;  %v47_v41 = vld [vmem:[%s954_s1 + $0xa0] sm:$0xff]  ;;  %v45_v45 = vld [vmem:[%s954_s1 + $0x90] sm:$0xff]  ;;  %v44_v47 = vld [vmem:[%s954_s1 + $0x88] sm:$0xff] }
  0x10   :  { %173 = vmatprep.subr.mxu1 %v473_v0  ;;  %74 = vmatpush1.msra.mxu0 %v35_v15  ;;  %v154_v42 = vld [vmem:[%s955_s2 + $0xa0] sm:$0xff]  ;;  %v152_v46 = vld [vmem:[%s955_s2 + $0x90] sm:$0xff]  ;;  %v151_v48 = vld [vmem:[%s955_s2 + $0x88] sm:$0xff] }
  0x11   :  { %174 = vmatpush1.msra.mxu1 %v142_v16  ;;  %75 = vmatprep.subr.mxu0 %v473_v0  ;;  %v43_v49 = vld [vmem:[%s954_s1 + $0x80] sm:$0xff]  ;;  %v708_v50 = vld [vmem:[%s956_s0 + $0x8] sm:$0xff]  ;;  %v251_v53 = vld [vmem:[%s957_s3 + $0x78] sm:$0xff] }
  0x12   :  { %175 = vmatprep.subr.mxu1 %v473_v0  ;;  %76 = vmatpush1.msra.mxu0 %v34_v17  ;;  %v150_v51 = vld [vmem:[%s955_s2 + $0x80] sm:$0xff]  ;;  %v353_v54 = vld [vmem:[%s958_s4 + $0x78] sm:$0xff]  ;;  %v250_v55 = vld [vmem:[%s957_s3 + $0x70] sm:$0xff] }
  0x13   :  { %176 = vmatpush1.msra.mxu1 %v141_v18  ;;  %77 = vmatprep.subr.mxu0 %v473_v0  ;;  %v716_v52 = vld [vmem:[%s956_s0] sm:$0xff]  ;;  %v352_v56 = vld [vmem:[%s958_s4 + $0x70] sm:$0xff]  ;;  %v249_v57 = vld [vmem:[%s957_s3 + $0x68] sm:$0xff] }
  0x14   :  { %177 = vmatprep.subr.mxu1 %v473_v0  ;;  %78 = vmatpush1.msra.mxu0 %v33_v19  ;;  %v351_v58 = vld [vmem:[%s958_s4 + $0x68] sm:$0xff]  ;;  %v248_v59 = vld [vmem:[%s957_s3 + $0x60] sm:$0xff]  ;;  %v247_v61 = vld [vmem:[%s957_s3 + $0x58] sm:$0xff] }
  0x15   :  { %178 = vmatpush1.msra.mxu1 %v140_v20  ;;  %79 = vmatprep.subr.mxu0 %v473_v0  ;;  %v350_v60 = vld [vmem:[%s958_s4 + $0x60] sm:$0xff]  ;;  %v349_v62 = vld [vmem:[%s958_s4 + $0x58] sm:$0xff]  ;;  %v246_v63 = vld [vmem:[%s957_s3 + $0x50] sm:$0xff] }
  0x16   :  { %179 = vmatprep.subr.mxu1 %v473_v0  ;;  %80 = vmatpush1.msra.mxu0 %v32_v21  ;;  %v348_v1 = vld [vmem:[%s958_s4 + $0x50] sm:$0xff]  ;;  %v245_v2 = vld [vmem:[%s957_s3 + $0x48] sm:$0xff]  ;;  %v244_v4 = vld [vmem:[%s957_s3 + $0x40] sm:$0xff] }
  0x17   :  { %180 = vmatpush1.msra.mxu1 %v139_v22  ;;  %81 = vmatprep.subr.mxu0 %v473_v0  ;;  %v347_v3 = vld [vmem:[%s958_s4 + $0x48] sm:$0xff]  ;;  %v346_v5 = vld [vmem:[%s958_s4 + $0x40] sm:$0xff]  ;;  %v243_v6 = vld [vmem:[%s957_s3 + $0x38] sm:$0xff] }
  0x18   :  { %181 = vmatprep.subr.mxu1 %v473_v0  ;;  %82 = vmatpush1.msra.mxu0 %v31_v23  ;;  %v345_v7 = vld [vmem:[%s958_s4 + $0x38] sm:$0xff]  ;;  %v242_v8 = vld [vmem:[%s957_s3 + $0x30] sm:$0xff]  ;;  %v241_v10 = vld [vmem:[%s957_s3 + $0x28] sm:$0xff] }
  0x19   :  { %182 = vmatpush1.msra.mxu1 %v138_v24  ;;  %83 = vmatprep.subr.mxu0 %v473_v0  ;;  %v344_v9 = vld [vmem:[%s958_s4 + $0x30] sm:$0xff]  ;;  %v343_v11 = vld [vmem:[%s958_s4 + $0x28] sm:$0xff]  ;;  %v240_v12 = vld [vmem:[%s957_s3 + $0x20] sm:$0xff] }
  0x1a   :  { %183 = vmatprep.subr.mxu1 %v473_v0  ;;  %84 = vmatpush1.msra.mxu0 %v30_v25  ;;  %v342_v13 = vld [vmem:[%s958_s4 + $0x20] sm:$0xff]  ;;  %v239_v14 = vld [vmem:[%s957_s3 + $0x18] sm:$0xff]  ;;  %v238_v16 = vld [vmem:[%s957_s3 + $0x10] sm:$0xff] }
  0x1b   :  { %184 = vmatpush1.msra.mxu1 %v137_v26  ;;  %85 = vmatprep.subr.mxu0 %v473_v0  ;;  %v341_v15 = vld [vmem:[%s958_s4 + $0x18] sm:$0xff]  ;;  %v340_v17 = vld [vmem:[%s958_s4 + $0x10] sm:$0xff]  ;;  %v237_v18 = vld [vmem:[%s957_s3 + $0x8] sm:$0xff] }
  0x1c   :  { %185 = vmatprep.subr.mxu1 %v473_v0  ;;  %86 = vmatpush1.msra.mxu0 %v29_v27  ;;  %v339_v19 = vld [vmem:[%s958_s4 + $0x8] sm:$0xff]  ;;  %v236_v20 = vld [vmem:[%s957_s3] sm:$0xff]  ;;  %v259_v24 = vld [vmem:[%s957_s3 + $0xb8] sm:$0xff] }
  0x1d   :  { %186 = vmatpush1.msra.mxu1 %v136_v28  ;;  %87 = vmatprep.subr.mxu0 %v473_v0  ;;  %v338_v21 = vld [vmem:[%s958_s4] sm:$0xff]  ;;  %v361_v25 = vld [vmem:[%s958_s4 + $0xb8] sm:$0xff]  ;;  %v258_v26 = vld [vmem:[%s957_s3 + $0xb0] sm:$0xff] }
  0x1e   :  { %187 = vmatprep.subr.mxu1 %v473_v0  ;;  %88 = vmatpush1.msra.mxu0 %v28_v29  ;;  %v260_v22 = vld [vmem:[%s957_s3 + $0xc0] sm:$0xff]  ;;  %v360_v27 = vld [vmem:[%s958_s4 + $0xb0] sm:$0xff]  ;;  %v257_v28 = vld [vmem:[%s957_s3 + $0xa8] sm:$0xff] }
  0x1f   :  { %188 = vmatpush1.msra.mxu1 %v135_v30  ;;  %89 = vmatprep.subr.mxu0 %v473_v0  ;;  %v362_v23 = vld [vmem:[%s958_s4 + $0xc0] sm:$0xff]  ;;  %v359_v29 = vld [vmem:[%s958_s4 + $0xa8] sm:$0xff] }
  0x20   :  { %189 = vmatprep.subr.mxu1 %v473_v0  ;;  %90 = vmatpush1.msra.mxu0 %v27_v31  ;;  %v256_v30 = vld [vmem:[%s957_s3 + $0xa0] sm:$0xff] }
  0x21   :  { %190 = vmatpush1.msra.mxu1 %v134_v32  ;;  %105 = vmatprep.subr.mxu0 %v473_v0  ;;  %v358_v31 = vld [vmem:[%s958_s4 + $0xa0] sm:$0xff]  ;;  %v26_v32 = vld [vmem:[%s956_s0 + $0x18] sm:$0xff] }
  0x22   :  { %205 = vmatprep.subr.mxu1 %v473_v0  ;;  %106 = vmatpush2.msra.mxu0 %v51_v33  ;;  %v255_v33 = vld [vmem:[%s957_s3 + $0x98] sm:$0xff] }
  0x23   :  { %206 = vmatpush2.msra.mxu1 %v158_v34  ;;  %107 = vmatprep.subr.mxu0 %v473_v0  ;;  %v357_v34 = vld [vmem:[%s958_s4 + $0x98] sm:$0xff] }
  0x24   :  { %207 = vmatprep.subr.mxu1 %v473_v0  ;;  %108 = vmatpush2.msra.mxu0 %v50_v35  ;;  %v25_v35 = vld [vmem:[%s956_s0 + $0x10] sm:$0xff] }
  0x25   :  { %208 = vmatpush2.msra.mxu1 %v157_v36  ;;  %109 = vmatprep.subr.mxu0 %v473_v0  ;;  %v254_v36 = vld [vmem:[%s957_s3 + $0x90] sm:$0xff] }
  0x26   :  { %209 = vmatprep.subr.mxu1 %v473_v0  ;;  %110 = vmatpush2.msra.mxu0 %v49_v37  ;;  %v356_v37 = vld [vmem:[%s958_s4 + $0x90] sm:$0xff] }
  0x27   :  { %210 = vmatpush2.msra.mxu1 %v156_v38  ;;  %111 = vmatprep.subr.mxu0 %v473_v0  ;;  %v253_v38 = vld [vmem:[%s957_s3 + $0x88] sm:$0xff] }
  0x28   :  { %211 = vmatprep.subr.mxu1 %v473_v0  ;;  %112 = vmatpush2.msra.mxu0 %v48_v39  ;;  %v355_v39 = vld [vmem:[%s958_s4 + $0x88] sm:$0xff] }
  0x29   :  { %212 = vmatpush2.msra.mxu1 %v155_v40  ;;  %113 = vmatprep.subr.mxu0 %v473_v0  ;;  %v252_v40 = vld [vmem:[%s957_s3 + $0x80] sm:$0xff] }
  0x2a   :  { %213 = vmatprep.subr.mxu1 %v473_v0  ;;  %114 = vmatpush2.msra.mxu0 %v47_v41  ;;  %v354_v41 = vld [vmem:[%s958_s4 + $0x80] sm:$0xff] }
  0x2b   :  { %214 = vmatpush2.msra.mxu1 %v154_v42  ;;  %115 = vmatprep.subr.mxu0 %v473_v0  ;;  %v440_v42 = vld [vmem:[%s959_s5] sm:$0xff] }
  0x2c   :  { %215 = vmatprep.subr.mxu1 %v473_v0  ;;  %116 = vmatpush2.msra.mxu0 %v46_v43  ;;  %v441_v43 = vld [vmem:[%s959_s5 + $0x8] sm:$0xff] }
  0x2d   :  { %216 = vmatpush2.msra.mxu1 %v153_v44  ;;  %117 = vmatprep.subr.mxu0 %v473_v0 }
  0x2e   :  { %217 = vmatprep.subr.mxu1 %v473_v0  ;;  %118 = vmatpush2.msra.mxu0 %v45_v45 }
  0x2f   :  { %218 = vmatpush2.msra.mxu1 %v152_v46  ;;  %119 = vmatprep.subr.mxu0 %v473_v0 }
  0x30   :  { %219 = vmatprep.subr.mxu1 %v473_v0  ;;  %120 = vmatpush2.msra.mxu0 %v44_v47 }
  0x31   :  { %220 = vmatpush2.msra.mxu1 %v151_v48  ;;  %121 = vmatprep.subr.mxu0 %v473_v0 }
  0x32   :  { %221 = vmatprep.subr.mxu1 %v473_v0  ;;  %122 = vmatpush2.msra.mxu0 %v43_v49 }
  0x33   :  { %462 = vmatprep.mubr.msk.f32.mxu0 %vm52_vm0, %v708_v50  ;;  %222 = vmatpush2.msra.mxu1 %v150_v51 }
  0x34   :  { %124 = vmatmul.mubr.f32.vlgmr.msra.gmra.mxu0 %v716_v52  ;;  %464 = vmatprep.mubr.msk.f32.mxu1 %vm52_vm0, %v708_v50 }
  0x35   :  { %261 = vmatprep.subr.mxu0 %v473_v0  ;;  %363 = vmatprep.subr.mxu1 %v473_v0 }
  0x36   :  { %224 = vmatmul.mubr.f32.vlgmr.msra.gmra.mxu1 %v716_v52  ;;  %262 = vmatpush1.msra.mxu0 %v251_v53 }
  0x37   :  { %364 = vmatpush1.msra.mxu1 %v353_v54  ;;  %263 = vmatprep.subr.mxu0 %v473_v0 }
  0x38   :  { %365 = vmatprep.subr.mxu1 %v473_v0  ;;  %264 = vmatpush1.msra.mxu0 %v250_v55 }
  0x39   :  { %366 = vmatpush1.msra.mxu1 %v352_v56  ;;  %265 = vmatprep.subr.mxu0 %v473_v0 }
  0x3a   :  { %367 = vmatprep.subr.mxu1 %v473_v0  ;;  %266 = vmatpush1.msra.mxu0 %v249_v57 }
  0x3b   :  { %368 = vmatpush1.msra.mxu1 %v351_v58  ;;  %267 = vmatprep.subr.mxu0 %v473_v0 }
  0x3c   :  { %369 = vmatprep.subr.mxu1 %v473_v0  ;;  %268 = vmatpush1.msra.mxu0 %v248_v59 }
  0x3d   :  { %370 = vmatpush1.msra.mxu1 %v350_v60  ;;  %269 = vmatprep.subr.mxu0 %v473_v0 }
  0x3e   :  { %371 = vmatprep.subr.mxu1 %v473_v0  ;;  %270 = vmatpush1.msra.mxu0 %v247_v61 }
  0x3f   :  { %372 = vmatpush1.msra.mxu1 %v349_v62  ;;  %271 = vmatprep.subr.mxu0 %v473_v0 }
  0x40   :  { %373 = vmatprep.subr.mxu1 %v473_v0  ;;  %272 = vmatpush1.msra.mxu0 %v246_v63 }
  0x41   :  { %374 = vmatpush1.msra.mxu1 %v348_v1  ;;  %273 = vmatprep.subr.mxu0 %v473_v0 }
  0x42   :  { %375 = vmatprep.subr.mxu1 %v473_v0  ;;  %274 = vmatpush1.msra.mxu0 %v245_v2 }
  0x43   :  { %376 = vmatpush1.msra.mxu1 %v347_v3  ;;  %275 = vmatprep.subr.mxu0 %v473_v0 }
  0x44   :  { %377 = vmatprep.subr.mxu1 %v473_v0  ;;  %276 = vmatpush1.msra.mxu0 %v244_v4 }
  0x45   :  { %378 = vmatpush1.msra.mxu1 %v346_v5  ;;  %277 = vmatprep.subr.mxu0 %v473_v0 }
  0x46   :  { %379 = vmatprep.subr.mxu1 %v473_v0  ;;  %278 = vmatpush1.msra.mxu0 %v243_v6 }
  0x47   :  { %380 = vmatpush1.msra.mxu1 %v345_v7  ;;  %279 = vmatprep.subr.mxu0 %v473_v0 }
  0x48   :  { %381 = vmatprep.subr.mxu1 %v473_v0  ;;  %280 = vmatpush1.msra.mxu0 %v242_v8 }
  0x49   :  { %382 = vmatpush1.msra.mxu1 %v344_v9  ;;  %281 = vmatprep.subr.mxu0 %v473_v0 }
  0x4a   :  { %383 = vmatprep.subr.mxu1 %v473_v0  ;;  %282 = vmatpush1.msra.mxu0 %v241_v10 }
  0x4b   :  { %384 = vmatpush1.msra.mxu1 %v343_v11  ;;  %283 = vmatprep.subr.mxu0 %v473_v0 }
  0x4c   :  { %385 = vmatprep.subr.mxu1 %v473_v0  ;;  %284 = vmatpush1.msra.mxu0 %v240_v12 }
  0x4d   :  { %386 = vmatpush1.msra.mxu1 %v342_v13  ;;  %285 = vmatprep.subr.mxu0 %v473_v0 }
  0x4e   :  { %387 = vmatprep.subr.mxu1 %v473_v0  ;;  %286 = vmatpush1.msra.mxu0 %v239_v14 }
  0x4f   :  { %388 = vmatpush1.msra.mxu1 %v341_v15  ;;  %287 = vmatprep.subr.mxu0 %v473_v0 }
  0x50   :  { %389 = vmatprep.subr.mxu1 %v473_v0  ;;  %288 = vmatpush1.msra.mxu0 %v238_v16 }
  0x51   :  { %390 = vmatpush1.msra.mxu1 %v340_v17  ;;  %289 = vmatprep.subr.mxu0 %v473_v0 }
  0x52   :  { %391 = vmatprep.subr.mxu1 %v473_v0  ;;  %290 = vmatpush1.msra.mxu0 %v237_v18 }
  0x53   :  { %392 = vmatpush1.msra.mxu1 %v339_v19  ;;  %291 = vmatprep.subr.mxu0 %v473_v0 }
  0x54   :  { %393 = vmatprep.subr.mxu1 %v473_v0  ;;  %292 = vmatpush1.msra.mxu0 %v236_v20 }
  0x55   :  { %394 = vmatpush1.msra.mxu1 %v338_v21  ;;  %307 = vmatprep.subr.mxu0 %v473_v0 }
  0x56   :  { %409 = vmatprep.subr.mxu1 %v473_v0  ;;  %308 = vmatpush2.msra.mxu0 %v260_v22 }
  0x57   :  { %410 = vmatpush2.msra.mxu1 %v362_v23  ;;  %309 = vmatprep.subr.mxu0 %v473_v0 }
  0x58   :  { %411 = vmatprep.subr.mxu1 %v473_v0  ;;  %310 = vmatpush2.msra.mxu0 %v259_v24 }
  0x59   :  { %412 = vmatpush2.msra.mxu1 %v361_v25  ;;  %311 = vmatprep.subr.mxu0 %v473_v0 }
  0x5a   :  { %413 = vmatprep.subr.mxu1 %v473_v0  ;;  %312 = vmatpush2.msra.mxu0 %v258_v26 }
  0x5b   :  { %414 = vmatpush2.msra.mxu1 %v360_v27  ;;  %313 = vmatprep.subr.mxu0 %v473_v0 }
  0x5c   :  { %415 = vmatprep.subr.mxu1 %v473_v0  ;;  %314 = vmatpush2.msra.mxu0 %v257_v28 }
  0x5d   :  { %416 = vmatpush2.msra.mxu1 %v359_v29  ;;  %315 = vmatprep.subr.mxu0 %v473_v0 }
  0x5e   :  { %417 = vmatprep.subr.mxu1 %v473_v0  ;;  %316 = vmatpush2.msra.mxu0 %v256_v30 }
  0x5f   :  { %418 = vmatpush2.msra.mxu1 %v358_v31  ;;  %317 = vmatprep.subr.mxu0 %v473_v0 }
  0x60   :  { %419 = vmatprep.subr.mxu1 %v473_v0  ;;  %463 = vmatprep.mubr.msk.f32.mxu0 %vm52_vm0, %v26_v32 }
  0x61   :  { %318 = vmatpush2.msra.mxu0 %v255_v33  ;;  %420 = vmatpush2.msra.mxu1 %v357_v34 }
  0x62   :  { %129 = vmatmul.mubr.f32.gmra.mxu0 %v25_v35  ;;  %319 = vmatprep.subr.mxu0 %v473_v0 }
  0x63   :  { %421 = vmatprep.subr.mxu1 %v473_v0  ;;  %465 = vmatprep.mubr.msk.f32.mxu1 %vm52_vm0, %v26_v32 }
  0x64   :  { %320 = vmatpush2.msra.mxu0 %v254_v36  ;;  %422 = vmatpush2.msra.mxu1 %v356_v37 }
  0x65   :  { %321 = vmatprep.subr.mxu0 %v473_v0  ;;  %229 = vmatmul.mubr.f32.gmra.mxu1 %v25_v35 }
  0x66   :  { %423 = vmatprep.subr.mxu1 %v473_v0  ;;  %322 = vmatpush2.msra.mxu0 %v253_v38 }
  0x67   :  { %424 = vmatpush2.msra.mxu1 %v355_v39  ;;  %323 = vmatprep.subr.mxu0 %v473_v0 }
  0x68   :  { %425 = vmatprep.subr.mxu1 %v473_v0  ;;  %324 = vmatpush2.msra.mxu0 %v252_v40  ;;  %v474_v0 = vmov 0  }
  0x69   :  { %466 = vmatprep.mubr.msk.f32.mxu0 %vm52_vm0, %v708_v50  ;;  %426 = vmatpush2.msra.mxu1 %v354_v41 }
  0x6a   :  { %468 = vmatprep.mubr.msk.f32.mxu1 %vm52_vm0, %v708_v50  ;;  %326 = vmatmul.mubr.f32.vlgmr.msra.gmra.mxu0 %v716_v52 }
  0x6b   :  { %428 = vmatmul.mubr.f32.vlgmr.msra.gmra.mxu1 %v716_v52  ;;  %467 = vmatprep.mubr.msk.f32.mxu0 %vm52_vm0, %v26_v32 }
  0x6c   :  { %469 = vmatprep.mubr.msk.f32.mxu1 %vm52_vm0, %v26_v32  ;;  %472 = vset.pattern.permute.xlu0 %v474_v0 }
  0x6d   :  { %444 = vperm.xlu0 %472, %v440_v42  }
  0x6e   :  { %331 = vmatmul.mubr.f32.gmra.mxu0 %v25_v35 }
  0x6f   :  { %433 = vmatmul.mubr.f32.gmra.mxu1 %v25_v35 }
  0x71   :  { %449 = vperm.xlu0 %472, %v441_v43  }
  0xe8   :  { %v445_v55 = vpop.permute.xlu0 %444 }
  0xec   :  { %v450_v6 = vpop.permute.xlu0 %449 }
  0xf4   :  { %v125_v44 = vpop.f32.mrf.mxu0 }
  0xf6   :  { %v225_v45 = vpop.f32.mrf.mxu1  ;;  %v127_v46 = vpop.f32.mrf.mxu0 }
  0xf7   :  { %v234_v52 = vmax.f32 %v125_v44, %v225_v45 }
  0xf8   :  { %v227_v47 = vpop.f32.mrf.mxu1 }
 0x122   :  { %v130_v48 = vpop.f32.mrf.mxu0 }
 0x124   :  { %v132_v49 = vpop.f32.mrf.mxu0 }
 0x125   :  { %v230_v50 = vpop.f32.mrf.mxu1 }
 0x126   :  { %v235_v59 = vmax.f32 %v130_v48, %v230_v50 }
 0x127   :  { %v232_v51 = vpop.f32.mrf.mxu1 }
 0x12a   :  { %v327_v53 = vpop.f32.mrf.mxu0 }
 0x12b   :  { %v429_v54 = vpop.f32.mrf.mxu1  ;;  %v336_v56 = vmax.f32 %v234_v52, %v327_v53 }
 0x12c   :  { %v329_v57 = vpop.f32.mrf.mxu0 }
 0x12d   :  { %v431_v58 = vpop.f32.mrf.mxu1  ;;  %v438_v60 = vmax.f32 %v336_v56, %v429_v54 }
 0x12e   :  { %v332_v61 = vpop.f32.mrf.mxu0 }
 0x12f   :  { %v434_v62 = vpop.f32.mrf.mxu1  ;;  %v452_v63 = vadd.f32 %v445_v55, %v438_v60  ;;  %v337_v1 = vmax.f32 %v235_v59, %v332_v61 }
 0x130   :  { %v334_v2 = vpop.f32.mrf.mxu0 }
 0x131   :  { %v436_v3 = vpop.f32.mrf.mxu1  ;;  %v454_v4 = vmax.f32 %v452_v63, 0.0  ;;  %v439_v5 = vmax.f32 %v337_v1, %v434_v62 }
 0x133   :  { %456 = vst [vmem:[%s960_s6] sm:$0xff] %v454_v4  ;;  %v453_v7 = vadd.f32 %v450_v6, %v439_v5 }
 0x135   :  { %v455_v8 = vmax.f32 %v453_v7, 0.0 }
 0x137   :  { %457 = vst [vmem:[%s960_s6 + $0x8] sm:$0xff] %v455_v8 }

// kernel: net_forward.5
= control target key start
LH: loop header
LB: loop body
LE: loop exit
PB: predicated region body
PF: predicated region fallthrough
CT: control target
= control target key end

     0   :  { %v1185_v3 = vmov 0   ;;  %v1186_v37 = vmov 0.0   ;;  %vm226_vm0 = vcmask 130048   ;;  %vm1187_vm1 = vmmov 0   ;;  %s1839_s0 = inlined_call_operand.vmem [shape: f32[400,2], index: 0, kind: input, shape index: {}]   ;;  %s1840_s1 = inlined_call_operand.vmem [shape: f32[120,400], index: 1, kind: input, shape index: {}]   ;;  %s1841_s2 = inlined_call_operand.vmem [shape: f32[120,1], index: 2, kind: input, shape index: {}]   ;;  %s1842_s4 = inlined_call_operand.vmem [shape: f32[84,1], index: 4, kind: input, shape index: {}]   ;;  %s1843_s6 = inlined_call_operand.vmem [shape: f32[10,1], index: 6, kind: input, shape index: {}]   ;;  %s1844_s3 = inlined_call_operand.vmem [shape: f32[84,120], index: 3, kind: input, shape index: {}]   ;;  %s1845_s5 = inlined_call_operand.vmem [shape: f32[10,84], index: 5, kind: input, shape index: {}]   ;;  %s1846_s7 = inlined_call_operand.vmem [shape: f32[10,2], index: 7, kind: output, shape index: {}]  }
   0x1   :  { %v117_v0 = vld [vmem:[%s1839_s0 + $0xf8] sm:$0xff]  ;;  %v116_v2 = vld [vmem:[%s1839_s0 + $0xf0] sm:$0xff]  ;;  %1183 = vset.pattern.permute.xlu0 %v1185_v3  ;;  %1184 = vset.pattern.permute.xlu1 %v1185_v3  ;;  %v115_v5 = vld [vmem:[%s1839_s0 + $0xe8] sm:$0xff]  ;;  %vm644_vm2 = vcmask 982016   ;;  %vm823_vm3 = vcmask 687104   ;;  %vm830_vm4 = vcmask 1043456  }
   0x2   :  { %v101_v1 = vld [vmem:[%s1839_s0 + $0x78] sm:$0xff]  ;;  %1148 = vmatprep.subr.mxu1 %v117_v0  ;;  %v100_v4 = vld [vmem:[%s1839_s0 + $0x70] sm:$0xff]  ;;  %944 = vmatprep.subr.mxu0 %v117_v0  ;;  %v99_v6 = vld [vmem:[%s1839_s0 + $0x68] sm:$0xff] }
   0x3   :  { %1164 = vmatpush3.msra.mxu1 %v101_v1  ;;  %945 = vmatpush3.msra.mxu0 %v101_v1  ;;  %v114_v7 = vld [vmem:[%s1839_s0 + $0xe0] sm:$0xff]  ;;  %v113_v9 = vld [vmem:[%s1839_s0 + $0xd8] sm:$0xff]  ;;  %v112_v11 = vld [vmem:[%s1839_s0 + $0xd0] sm:$0xff] }
   0x4   :  { %1149 = vmatprep.subr.mxu1 %v116_v2  ;;  %946 = vmatprep.subr.mxu0 %v116_v2  ;;  %v98_v8 = vld [vmem:[%s1839_s0 + $0x60] sm:$0xff]  ;;  %v97_v10 = vld [vmem:[%s1839_s0 + $0x58] sm:$0xff]  ;;  %v96_v12 = vld [vmem:[%s1839_s0 + $0x50] sm:$0xff] }
   0x5   :  { %1165 = vmatpush3.msra.mxu1 %v100_v4  ;;  %947 = vmatpush3.msra.mxu0 %v100_v4  ;;  %v111_v13 = vld [vmem:[%s1839_s0 + $0xc8] sm:$0xff]  ;;  %v110_v16 = vld [vmem:[%s1839_s0 + $0xc0] sm:$0xff]  ;;  %v109_v18 = vld [vmem:[%s1839_s0 + $0xb8] sm:$0xff] }
   0x6   :  { %1150 = vmatprep.subr.mxu1 %v115_v5  ;;  %948 = vmatprep.subr.mxu0 %v115_v5  ;;  %v59_v14 = vld [vmem:[%s1840_s1 + $0x108] sm:$0xff]  ;;  %v94_v17 = vld [vmem:[%s1839_s0 + $0x40] sm:$0xff]  ;;  %v93_v19 = vld [vmem:[%s1839_s0 + $0x38] sm:$0xff] }
   0x7   :  { %1166 = vmatpush3.msra.mxu1 %v99_v6  ;;  %949 = vmatpush3.msra.mxu0 %v99_v6  ;;  %v95_v15 = vld [vmem:[%s1839_s0 + $0x48] sm:$0xff]  ;;  %v108_v20 = vld [vmem:[%s1839_s0 + $0xb0] sm:$0xff]  ;;  %v106_v24 = vld [vmem:[%s1839_s0 + $0xa0] sm:$0xff] }
   0x8   :  { %1151 = vmatprep.subr.mxu1 %v114_v7  ;;  %950 = vmatprep.subr.mxu0 %v114_v7  ;;  %v92_v21 = vld [vmem:[%s1839_s0 + $0x30] sm:$0xff]  ;;  %v107_v22 = vld [vmem:[%s1839_s0 + $0xa8] sm:$0xff]  ;;  %v90_v25 = vld [vmem:[%s1839_s0 + $0x20] sm:$0xff] }
   0x9   :  { %1167 = vmatpush3.msra.mxu1 %v98_v8  ;;  %951 = vmatpush3.msra.mxu0 %v98_v8  ;;  %v91_v23 = vld [vmem:[%s1839_s0 + $0x28] sm:$0xff]  ;;  %v105_v26 = vld [vmem:[%s1839_s0 + $0x98] sm:$0xff]  ;;  %v104_v28 = vld [vmem:[%s1839_s0 + $0x90] sm:$0xff] }
   0xa   :  { %1152 = vmatprep.subr.mxu1 %v113_v9  ;;  %952 = vmatprep.subr.mxu0 %v113_v9  ;;  %v89_v27 = vld [vmem:[%s1839_s0 + $0x18] sm:$0xff]  ;;  %v88_v29 = vld [vmem:[%s1839_s0 + $0x10] sm:$0xff]  ;;  %v103_v30 = vld [vmem:[%s1839_s0 + $0x88] sm:$0xff] }
   0xb   :  { %1168 = vmatpush3.msra.mxu1 %v97_v10  ;;  %953 = vmatpush3.msra.mxu0 %v97_v10  ;;  %v87_v31 = vld [vmem:[%s1839_s0 + $0x8] sm:$0xff]  ;;  %v102_v32 = vld [vmem:[%s1839_s0 + $0x80] sm:$0xff]  ;;  %v133_v35 = vld [vmem:[%s1839_s0 + $0x178] sm:$0xff] }
   0xc   :  { %1153 = vmatprep.subr.mxu1 %v112_v11  ;;  %376 = vmatprep.mubr.f32.mxu1 %v59_v14  ;;  %v86_v33 = vld [vmem:[%s1839_s0] sm:$0xff]  ;;  %v63_v36 = vld [vmem:[%s1840_s1 + $0x128] sm:$0xff]  ;;  %v132_v38 = vld [vmem:[%s1839_s0 + $0x170] sm:$0xff] }
   0xd   :  { %1169 = vmatpush3.msra.mxu1 %v96_v12  ;;  %954 = vmatprep.subr.mxu0 %v112_v11  ;;  %v58_v34 = vld [vmem:[%s1840_s1 + $0x100] sm:$0xff]  ;;  %v27_v39 = vld [vmem:[%s1840_s1 + $0x8] sm:$0xff]  ;;  %v129_v47 = vld [vmem:[%s1839_s0 + $0x158] sm:$0xff] }
   0xe   :  { %1154 = vmatprep.subr.mxu1 %v111_v13  ;;  %955 = vmatpush3.msra.mxu0 %v96_v12  ;;  %v62_v40 = vld [vmem:[%s1840_s1 + $0x120] sm:$0xff]  ;;  %v131_v41 = vld [vmem:[%s1839_s0 + $0x168] sm:$0xff]  ;;  %v128_v50 = vld [vmem:[%s1839_s0 + $0x150] sm:$0xff] }
   0xf   :  { %1170 = vmatpush3.msra.mxu1 %v95_v15  ;;  %956 = vmatprep.subr.mxu0 %v111_v13  ;;  %v67_v42 = vld [vmem:[%s1840_s1 + $0x148] sm:$0xff]  ;;  %v26_v43 = vld [vmem:[%s1840_s1] sm:$0xff]  ;;  %v125_v59 = vld [vmem:[%s1839_s0 + $0x138] sm:$0xff] }
  0x10   :  { %1155 = vmatprep.subr.mxu1 %v110_v16  ;;  %957 = vmatpush3.msra.mxu0 %v95_v15  ;;  %v130_v44 = vld [vmem:[%s1839_s0 + $0x160] sm:$0xff]  ;;  %v31_v45 = vld [vmem:[%s1840_s1 + $0x28] sm:$0xff]  ;;  %v124_v62 = vld [vmem:[%s1839_s0 + $0x130] sm:$0xff] }
  0x11   :  { %1171 = vmatpush3.msra.mxu1 %v94_v17  ;;  %958 = vmatprep.subr.mxu0 %v110_v16  ;;  %v66_v46 = vld [vmem:[%s1840_s1 + $0x140] sm:$0xff]  ;;  %v71_v48 = vld [vmem:[%s1840_s1 + $0x168] sm:$0xff]  ;;  %v121_v7 = vld [vmem:[%s1839_s0 + $0x118] sm:$0xff] }
  0x12   :  { %1156 = vmatprep.subr.mxu1 %v109_v18  ;;  %959 = vmatpush3.msra.mxu0 %v94_v17  ;;  %v30_v49 = vld [vmem:[%s1840_s1 + $0x20] sm:$0xff]  ;;  %v35_v51 = vld [vmem:[%s1840_s1 + $0x48] sm:$0xff]  ;;  %v29_v8 = vld [vmem:[%s1840_s1 + $0x18] sm:$0xff] }
  0x13   :  { %1172 = vmatpush3.msra.mxu1 %v93_v19  ;;  %960 = vmatprep.subr.mxu0 %v109_v18  ;;  %v70_v52 = vld [vmem:[%s1840_s1 + $0x160] sm:$0xff]  ;;  %v127_v53 = vld [vmem:[%s1839_s0 + $0x148] sm:$0xff]  ;;  %v120_v10 = vld [vmem:[%s1839_s0 + $0x110] sm:$0xff] }
  0x14   :  { %1157 = vmatprep.subr.mxu1 %v108_v20  ;;  %961 = vmatpush3.msra.mxu0 %v93_v19  ;;  %v75_v54 = vld [vmem:[%s1840_s1 + $0x188] sm:$0xff]  ;;  %v34_v55 = vld [vmem:[%s1840_s1 + $0x40] sm:$0xff]  ;;  %v150_v12 = vld [vmem:[%s1841_s2 + $0x70] sm:$0xff] }
  0x15   :  { %1173 = vmatpush3.msra.mxu1 %v92_v21  ;;  %962 = vmatprep.subr.mxu0 %v108_v20  ;;  %v126_v56 = vld [vmem:[%s1839_s0 + $0x140] sm:$0xff]  ;;  %v39_v57 = vld [vmem:[%s1840_s1 + $0x68] sm:$0xff]  ;;  %v147_v20 = vld [vmem:[%s1841_s2 + $0x58] sm:$0xff] }
  0x16   :  { %1158 = vmatprep.subr.mxu1 %v107_v22  ;;  %963 = vmatpush3.msra.mxu0 %v92_v21  ;;  %v74_v58 = vld [vmem:[%s1840_s1 + $0x180] sm:$0xff]  ;;  %v79_v60 = vld [vmem:[%s1840_s1 + $0x1a8] sm:$0xff] }
  0x17   :  { %1174 = vmatpush3.msra.mxu1 %v91_v23  ;;  %964 = vmatprep.subr.mxu0 %v107_v22  ;;  %v38_v61 = vld [vmem:[%s1840_s1 + $0x60] sm:$0xff]  ;;  %v43_v63 = vld [vmem:[%s1840_s1 + $0x88] sm:$0xff] }
  0x18   :  { %1159 = vmatprep.subr.mxu1 %v106_v24  ;;  %965 = vmatpush3.msra.mxu0 %v91_v23  ;;  %v78_v0 = vld [vmem:[%s1840_s1 + $0x1a0] sm:$0xff]  ;;  %v123_v1 = vld [vmem:[%s1839_s0 + $0x128] sm:$0xff]  ;;  %v28_v23 = vld [vmem:[%s1840_s1 + $0x10] sm:$0xff] }
  0x19   :  { %1175 = vmatpush3.msra.mxu1 %v90_v25  ;;  %966 = vmatprep.subr.mxu0 %v106_v24  ;;  %v83_v2 = vld [vmem:[%s1840_s1 + $0x1c8] sm:$0xff]  ;;  %v42_v3 = vld [vmem:[%s1840_s1 + $0x80] sm:$0xff]  ;;  %v146_v24 = vld [vmem:[%s1841_s2 + $0x50] sm:$0xff] }
  0x1a   :  { %1160 = vmatprep.subr.mxu1 %v105_v26  ;;  %967 = vmatpush3.msra.mxu0 %v90_v25  ;;  %v122_v4 = vld [vmem:[%s1839_s0 + $0x120] sm:$0xff]  ;;  %v47_v5 = vld [vmem:[%s1840_s1 + $0xa8] sm:$0xff]  ;;  %v33_v25 = vld [vmem:[%s1840_s1 + $0x38] sm:$0xff] }
  0x1b   :  { %1176 = vmatpush3.msra.mxu1 %v89_v27  ;;  %968 = vmatprep.subr.mxu0 %v105_v26  ;;  %v82_v6 = vld [vmem:[%s1840_s1 + $0x1c0] sm:$0xff]  ;;  %v51_v11 = vld [vmem:[%s1840_s1 + $0xc8] sm:$0xff] }
  0x1c   :  { %1161 = vmatprep.subr.mxu1 %v104_v28  ;;  %969 = vmatpush3.msra.mxu0 %v89_v27  ;;  %v46_v9 = vld [vmem:[%s1840_s1 + $0xa0] sm:$0xff]  ;;  %v119_v13 = vld [vmem:[%s1839_s0 + $0x108] sm:$0xff]  ;;  %v32_v27 = vld [vmem:[%s1840_s1 + $0x30] sm:$0xff] }
  0x1d   :  { %1177 = vmatpush3.msra.mxu1 %v88_v29  ;;  %970 = vmatprep.subr.mxu0 %v104_v28  ;;  %v148_v14 = vld [vmem:[%s1841_s2 + $0x60] sm:$0xff]  ;;  %v55_v17 = vld [vmem:[%s1840_s1 + $0xe8] sm:$0xff] }
  0x1e   :  { %1162 = vmatprep.subr.mxu1 %v103_v30  ;;  %971 = vmatpush3.msra.mxu0 %v88_v29  ;;  %v50_v15 = vld [vmem:[%s1840_s1 + $0xc0] sm:$0xff]  ;;  %v149_v18 = vld [vmem:[%s1841_s2 + $0x68] sm:$0xff]  ;;  %v37_v29 = vld [vmem:[%s1840_s1 + $0x58] sm:$0xff] }
  0x1f   :  { %1178 = vmatpush3.msra.mxu1 %v87_v31  ;;  %972 = vmatprep.subr.mxu0 %v103_v30  ;;  %v118_v16 = vld [vmem:[%s1839_s0 + $0x100] sm:$0xff]  ;;  %v135_v19 = vld [vmem:[%s1839_s0 + $0x188] sm:$0xff]  ;;  %v143_v30 = vld [vmem:[%s1841_s2 + $0x38] sm:$0xff] }
  0x20   :  { %1163 = vmatprep.subr.mxu1 %v102_v32  ;;  %973 = vmatpush3.msra.mxu0 %v87_v31  ;;  %v54_v21 = vld [vmem:[%s1840_s1 + $0xe0] sm:$0xff]  ;;  %v145_v26 = vld [vmem:[%s1841_s2 + $0x48] sm:$0xff]  ;;  %v36_v31 = vld [vmem:[%s1840_s1 + $0x50] sm:$0xff] }
  0x21   :  { %1179 = vmatpush3.msra.mxu1 %v86_v33  ;;  %974 = vmatprep.subr.mxu0 %v102_v32  ;;  %v134_v22 = vld [vmem:[%s1839_s0 + $0x180] sm:$0xff]  ;;  %v142_v32 = vld [vmem:[%s1841_s2 + $0x30] sm:$0xff] }
  0x22   :  { %377 = vmatmul.mubr.f32.vlgmr.msra.gmra.mxu1 %v58_v34  ;;  %412 = vmatprep.subr.mxu1 %v1186_v37  ;;  %v144_v28 = vld [vmem:[%s1841_s2 + $0x40] sm:$0xff]  ;;  %v141_v34 = vld [vmem:[%s1841_s2 + $0x28] sm:$0xff] }
  0x23   :  { %413 = vmatpush1.msra.mxu1 %v133_v35  ;;  %381 = vmatprep.mubr.f32.mxu1 %v63_v36  ;;  %v40_v35 = vld [vmem:[%s1840_s1 + $0x70] sm:$0xff]  ;;  %v140_v36 = vld [vmem:[%s1841_s2 + $0x20] sm:$0xff] }
  0x24   :  { %414 = vmatprep.subr.mxu1 %v1186_v37  ;;  %975 = vmatpush3.msra.mxu0 %v86_v33  ;;  %v41_v33 = vld [vmem:[%s1840_s1 + $0x78] sm:$0xff] }
  0x25   :  { %415 = vmatpush1.msra.mxu1 %v132_v38  ;;  %336 = vmatprep.mubr.f32.mxu0 %v27_v39  ;;  %v45_v38 = vld [vmem:[%s1840_s1 + $0x98] sm:$0xff] }
  0x26   :  { %416 = vmatprep.subr.mxu1 %v1186_v37  ;;  %382 = vmatmul.mubr.f32.gmra.mxu1 %v62_v40  ;;  %v139_v39 = vld [vmem:[%s1841_s2 + $0x18] sm:$0xff]  ;;  %v44_v40 = vld [vmem:[%s1840_s1 + $0x90] sm:$0xff] }
  0x27   :  { %417 = vmatpush1.msra.mxu1 %v131_v41  ;;  %386 = vmatprep.mubr.f32.mxu1 %v67_v42  ;;  %v138_v41 = vld [vmem:[%s1841_s2 + $0x10] sm:$0xff]  ;;  %v49_v42 = vld [vmem:[%s1840_s1 + $0xb8] sm:$0xff] }
  0x28   :  { %418 = vmatprep.subr.mxu1 %v1186_v37  ;;  %337 = vmatmul.mubr.f32.vlgmr.msra.gmra.mxu0 %v26_v43  ;;  %v137_v43 = vld [vmem:[%s1841_s2 + $0x8] sm:$0xff] }
  0x29   :  { %419 = vmatpush1.msra.mxu1 %v130_v44  ;;  %341 = vmatprep.mubr.f32.mxu0 %v31_v45  ;;  %v48_v44 = vld [vmem:[%s1840_s1 + $0xb0] sm:$0xff]  ;;  %v136_v45 = vld [vmem:[%s1841_s2] sm:$0xff] }
  0x2a   :  { %420 = vmatprep.subr.mxu1 %v1186_v37  ;;  %387 = vmatmul.mubr.f32.gmra.mxu1 %v66_v46  ;;  %v53_v46 = vld [vmem:[%s1840_s1 + $0xd8] sm:$0xff] }
  0x2b   :  { %421 = vmatpush1.msra.mxu1 %v129_v47  ;;  %391 = vmatprep.mubr.f32.mxu1 %v71_v48  ;;  %v588_v47 = vld [vmem:[%s1842_s4 + $0x50] sm:$0xf] }
  0x2c   :  { %422 = vmatprep.subr.mxu1 %v1186_v37  ;;  %342 = vmatmul.mubr.f32.gmra.mxu0 %v30_v49  ;;  %v52_v48 = vld [vmem:[%s1840_s1 + $0xd0] sm:$0xff]  ;;  %v587_v49 = vld [vmem:[%s1842_s4 + $0x48] sm:$0xff] }
  0x2d   :  { %423 = vmatpush1.msra.mxu1 %v128_v50  ;;  %346 = vmatprep.mubr.f32.mxu0 %v35_v51  ;;  %v57_v50 = vld [vmem:[%s1840_s1 + $0xf8] sm:$0xff]  ;;  %v586_v51 = vld [vmem:[%s1842_s4 + $0x40] sm:$0xff] }
  0x2e   :  { %424 = vmatprep.subr.mxu1 %v1186_v37  ;;  %392 = vmatmul.mubr.f32.gmra.mxu1 %v70_v52  ;;  %v56_v52 = vld [vmem:[%s1840_s1 + $0xf0] sm:$0xff] }
  0x2f   :  { %425 = vmatpush1.msra.mxu1 %v127_v53  ;;  %396 = vmatprep.mubr.f32.mxu1 %v75_v54  ;;  %v585_v53 = vld [vmem:[%s1842_s4 + $0x38] sm:$0xff] }
  0x30   :  { %426 = vmatprep.subr.mxu1 %v1186_v37  ;;  %347 = vmatmul.mubr.f32.gmra.mxu0 %v34_v55  ;;  %v61_v54 = vld [vmem:[%s1840_s1 + $0x118] sm:$0xff]  ;;  %v584_v55 = vld [vmem:[%s1842_s4 + $0x30] sm:$0xff] }
  0x31   :  { %427 = vmatpush1.msra.mxu1 %v126_v56  ;;  %351 = vmatprep.mubr.f32.mxu0 %v39_v57  ;;  %v60_v56 = vld [vmem:[%s1840_s1 + $0x110] sm:$0xff]  ;;  %v583_v57 = vld [vmem:[%s1842_s4 + $0x28] sm:$0xff] }
  0x32   :  { %428 = vmatprep.subr.mxu1 %v1186_v37  ;;  %397 = vmatmul.mubr.f32.gmra.mxu1 %v74_v58  ;;  %v65_v58 = vld [vmem:[%s1840_s1 + $0x138] sm:$0xff] }
  0x33   :  { %429 = vmatpush1.msra.mxu1 %v125_v59  ;;  %401 = vmatprep.mubr.f32.mxu1 %v79_v60  ;;  %v582_v59 = vld [vmem:[%s1842_s4 + $0x20] sm:$0xff]  ;;  %v64_v60 = vld [vmem:[%s1840_s1 + $0x130] sm:$0xff] }
  0x34   :  { %430 = vmatprep.subr.mxu1 %v1186_v37  ;;  %352 = vmatmul.mubr.f32.gmra.mxu0 %v38_v61  ;;  %v581_v61 = vld [vmem:[%s1842_s4 + $0x18] sm:$0xff] }
  0x35   :  { %431 = vmatpush1.msra.mxu1 %v124_v62  ;;  %356 = vmatprep.mubr.f32.mxu0 %v43_v63  ;;  %v69_v62 = vld [vmem:[%s1840_s1 + $0x158] sm:$0xff]  ;;  %v580_v63 = vld [vmem:[%s1842_s4 + $0x10] sm:$0xff] }
  0x36   :  { %432 = vmatprep.subr.mxu1 %v1186_v37  ;;  %402 = vmatmul.mubr.f32.gmra.mxu1 %v78_v0  ;;  %v68_v0 = vld [vmem:[%s1840_s1 + $0x150] sm:$0xff] }
  0x37   :  { %433 = vmatpush1.msra.mxu1 %v123_v1  ;;  %406 = vmatprep.mubr.f32.mxu1 %v83_v2  ;;  %v579_v1 = vld [vmem:[%s1842_s4 + $0x8] sm:$0xff]  ;;  %v73_v2 = vld [vmem:[%s1840_s1 + $0x178] sm:$0xff] }
  0x38   :  { %434 = vmatprep.subr.mxu1 %v1186_v37  ;;  %357 = vmatmul.mubr.f32.gmra.mxu0 %v42_v3  ;;  %v578_v3 = vld [vmem:[%s1842_s4] sm:$0xff] }
  0x39   :  { %435 = vmatpush1.msra.mxu1 %v122_v4  ;;  %361 = vmatprep.mubr.f32.mxu0 %v47_v5  ;;  %v72_v4 = vld [vmem:[%s1840_s1 + $0x170] sm:$0xff]  ;;  %v811_v5 = vld [vmem:[%s1843_s6] sm:$0xff] }
  0x3a   :  { %436 = vmatprep.subr.mxu1 %v1186_v37  ;;  %407 = vmatmul.mubr.f32.gmra.mxu1 %v82_v6  ;;  %v77_v6 = vld [vmem:[%s1840_s1 + $0x198] sm:$0xff] }
  0x3b   :  { %437 = vmatpush1.msra.mxu1 %v121_v7  ;;  %915 = vmatprep.mubr.msk.f32.mxu1 %vm226_vm0, %v29_v8  ;;  %v812_v7 = vld [vmem:[%s1843_s6 + $0x8] sm:$0x3]  ;;  %v76_v8 = vld [vmem:[%s1840_s1 + $0x190] sm:$0xff] }
  0x3c   :  { %438 = vmatprep.subr.mxu1 %v1186_v37  ;;  %362 = vmatmul.mubr.f32.gmra.mxu0 %v46_v9  ;;  %v81_v9 = vld [vmem:[%s1840_s1 + $0x1b8] sm:$0xff] }
  0x3d   :  { %439 = vmatpush1.msra.mxu1 %v120_v10  ;;  %366 = vmatprep.mubr.f32.mxu0 %v51_v11  ;;  %v80_v10 = vld [vmem:[%s1840_s1 + $0x1b0] sm:$0xff]  ;;  %v85_v11 = vld [vmem:[%s1840_s1 + $0x1d8] sm:$0xff] }
  0x3e   :  { %440 = vmatprep.subr.mxu1 %v1186_v37  ;;  %223 = vperm.xlu0 %1183, %v150_v12   ;;  %v84_v12 = vld [vmem:[%s1840_s1 + $0x1d0] sm:$0xff] }
  0x3f   :  { %441 = vmatpush1.msra.mxu1 %v119_v13  ;;  %213 = vperm.xlu1 %1184, %v148_v14  }
  0x40   :  { %442 = vmatprep.subr.mxu1 %v1186_v37  ;;  %367 = vmatmul.mubr.f32.gmra.mxu0 %v50_v15 }
  0x41   :  { %443 = vmatpush1.msra.mxu1 %v118_v16  ;;  %371 = vmatprep.mubr.f32.mxu0 %v55_v17 }
  0x42   :  { %472 = vmatprep.subr.mxu1 %v1186_v37  ;;  %218 = vperm.xlu0 %1183, %v149_v18  }
  0x43   :  { %473 = vmatpush2.msra.mxu1 %v135_v19  ;;  %208 = vperm.xlu1 %1184, %v147_v20  }
  0x44   :  { %474 = vmatprep.subr.mxu1 %v1186_v37  ;;  %372 = vmatmul.mubr.f32.gmra.mxu0 %v54_v21 }
  0x45   :  { %475 = vmatpush2.msra.mxu1 %v134_v22  ;;  %1060 = vmatprep.subr.mxu0 %v1186_v37 }
  0x46   :  { %477 = vmatmul.mubr.f32.vlgmr.msra.gmra.mxu1 %v28_v23  ;;  %203 = vperm.xlu0 %1183, %v146_v24  }
  0x47   :  { %916 = vmatprep.mubr.msk.f32.mxu1 %vm226_vm0, %v33_v25  ;;  %198 = vperm.xlu1 %1184, %v145_v26  }
  0x48   :  { %1090 = vmatprep.mubr.msk.f32.mxu0 %vm1187_vm1, %v1186_v37 }
  0x4a   :  { %482 = vmatmul.mubr.f32.gmra.mxu1 %v32_v27  ;;  %193 = vperm.xlu0 %1183, %v144_v28  }
  0x4b   :  { %917 = vmatprep.mubr.msk.f32.mxu1 %vm226_vm0, %v37_v29  ;;  %188 = vperm.xlu1 %1184, %v143_v30  }
  0x4e   :  { %487 = vmatmul.mubr.f32.gmra.mxu1 %v36_v31  ;;  %183 = vperm.xlu0 %1183, %v142_v32  }
  0x4f   :  { %918 = vmatprep.mubr.msk.f32.mxu1 %vm226_vm0, %v41_v33  ;;  %178 = vperm.xlu1 %1184, %v141_v34  }
  0x52   :  { %492 = vmatmul.mubr.f32.gmra.mxu1 %v40_v35  ;;  %173 = vperm.xlu0 %1183, %v140_v36  }
  0x53   :  { %919 = vmatprep.mubr.msk.f32.mxu1 %vm226_vm0, %v45_v38  ;;  %168 = vperm.xlu1 %1184, %v139_v39  }
  0x56   :  { %497 = vmatmul.mubr.f32.gmra.mxu1 %v44_v40  ;;  %163 = vperm.xlu0 %1183, %v138_v41  }
  0x57   :  { %920 = vmatprep.mubr.msk.f32.mxu1 %vm226_vm0, %v49_v42  ;;  %158 = vperm.xlu1 %1184, %v137_v43  }
  0x5a   :  { %502 = vmatmul.mubr.f32.gmra.mxu1 %v48_v44  ;;  %153 = vperm.xlu0 %1183, %v136_v45  }
  0x5b   :  { %921 = vmatprep.mubr.msk.f32.mxu1 %vm226_vm0, %v53_v46  ;;  %641 = vperm.xlu1 %1184, %v588_v47  }
  0x5e   :  { %507 = vmatmul.mubr.f32.gmra.mxu1 %v52_v48  ;;  %636 = vperm.xlu0 %1183, %v587_v49  }
  0x5f   :  { %922 = vmatprep.mubr.msk.f32.mxu1 %vm226_vm0, %v57_v50  ;;  %631 = vperm.xlu1 %1184, %v586_v51  }
  0x62   :  { %512 = vmatmul.mubr.f32.gmra.mxu1 %v56_v52  ;;  %626 = vperm.xlu0 %1183, %v585_v53  }
  0x63   :  { %923 = vmatprep.mubr.msk.f32.mxu1 %vm226_vm0, %v61_v54  ;;  %621 = vperm.xlu1 %1184, %v584_v55  }
  0x66   :  { %517 = vmatmul.mubr.f32.gmra.mxu1 %v60_v56  ;;  %616 = vperm.xlu0 %1183, %v583_v57  }
  0x67   :  { %924 = vmatprep.mubr.msk.f32.mxu1 %vm226_vm0, %v65_v58  ;;  %611 = vperm.xlu1 %1184, %v582_v59  }
  0x6a   :  { %522 = vmatmul.mubr.f32.gmra.mxu1 %v64_v60  ;;  %606 = vperm.xlu0 %1183, %v581_v61  }
  0x6b   :  { %925 = vmatprep.mubr.msk.f32.mxu1 %vm226_vm0, %v69_v62  ;;  %601 = vperm.xlu1 %1184, %v580_v63  }
  0x6e   :  { %527 = vmatmul.mubr.f32.gmra.mxu1 %v68_v0  ;;  %596 = vperm.xlu0 %1183, %v579_v1  }
  0x6f   :  { %926 = vmatprep.mubr.msk.f32.mxu1 %vm226_vm0, %v73_v2  ;;  %591 = vperm.xlu1 %1184, %v578_v3  }
  0x72   :  { %532 = vmatmul.mubr.f32.gmra.mxu1 %v72_v4  ;;  %815 = vperm.xlu0 %1183, %v811_v5  }
  0x73   :  { %927 = vmatprep.mubr.msk.f32.mxu1 %vm226_vm0, %v77_v6  ;;  %820 = vperm.xlu1 %1184, %v812_v7  }
  0x76   :  { %537 = vmatmul.mubr.f32.gmra.mxu1 %v76_v8 }
  0x77   :  { %928 = vmatprep.mubr.msk.f32.mxu1 %vm226_vm0, %v81_v9 }
  0x7a   :  { %542 = vmatmul.mubr.f32.gmra.mxu1 %v80_v10 }
  0x7b   :  { %929 = vmatprep.mubr.msk.f32.mxu1 %vm226_vm0, %v85_v11 }
  0x7e   :  { %547 = vmatmul.mubr.f32.gmra.mxu1 %v84_v12 }
  0xb9   :  { %v224_v61 = vpop.permute.xlu0 %223 }
  0xba   :  { %v214_v1 = vpop.permute.xlu1 %213 }
  0xbd   :  { %v219_v3 = vpop.permute.xlu0 %218 }
  0xbe   :  { %v209_v7 = vpop.permute.xlu1 %208 }
  0xc1   :  { %v204_v10 = vpop.permute.xlu0 %203 }
  0xe2   :  { %v1000_v13 = vpop.f32.mrf.mxu1 }
  0xe4   :  { %v1001_v14 = vpop.f32.mrf.mxu1 }
  0xe5   :  { %v1678_v15 = vadd.f32 %v1001_v14, %v1000_v13 }
  0xe6   :  { %v1003_v16 = vpop.f32.mrf.mxu1 }
  0xe8   :  { %v1004_v17 = vpop.f32.mrf.mxu1  ;;  %v1686_v31 = vpop.f32.mrf.mxu0 }
  0xe9   :  { %v1680_v18 = vadd.f32 %v1004_v17, %v1003_v16  ;;  %v199_v17 = vpop.permute.xlu1 %198 }
  0xea   :  { %v1006_v19 = vpop.f32.mrf.mxu1  ;;  %v1690_v34 = vpop.f32.mrf.mxu0 }
  0xec   :  { %v1007_v20 = vpop.f32.mrf.mxu1  ;;  %v1694_v38 = vpop.f32.mrf.mxu0 }
  0xed   :  { %v1682_v21 = vadd.f32 %v1007_v20, %v1006_v19  ;;  %v194_v20 = vpop.permute.xlu0 %193 }
  0xee   :  { %v1009_v22 = vpop.f32.mrf.mxu1  ;;  %v1698_v41 = vpop.f32.mrf.mxu0 }
  0xf0   :  { %v1010_v23 = vpop.f32.mrf.mxu1  ;;  %v1702_v44 = vpop.f32.mrf.mxu0 }
  0xf1   :  { %v1684_v24 = vadd.f32 %v1010_v23, %v1009_v22 }
  0xf2   :  { %v1012_v25 = vpop.f32.mrf.mxu1  ;;  %v1706_v47 = vpop.f32.mrf.mxu0 }
  0xf4   :  { %v1013_v26 = vpop.f32.mrf.mxu1  ;;  %v1710_v50 = vpop.f32.mrf.mxu0 }
  0xf5   :  { %v1014_v27 = vadd.f32 %v1013_v26, %v1012_v25 }
  0xf6   :  { %v1015_v28 = vpop.f32.mrf.mxu1  ;;  %v1714_v53 = vpop.f32.mrf.mxu0 }
  0xf8   :  { %v1016_v29 = vpop.f32.mrf.mxu1  ;;  %v1718_v56 = vpop.f32.mrf.mxu0 }
  0xf9   :  { %v1017_v14 = vadd.f32 %v1016_v29, %v1015_v28 }
  0xfa   :  { %v1018_v30 = vpop.f32.mrf.mxu1  ;;  %v989_v59 = vpop.f32.mrf.mxu0 }
  0xfb   :  { %v404_v25 = vadd.f32 %v1017_v14, %v219_v3 }
  0xfc   :  { %v1019_v32 = vpop.f32.mrf.mxu1  ;;  %v991_v63 = vpop.f32.mrf.mxu0 }
  0xfd   :  { %v1020_v16 = vadd.f32 %v1019_v32, %v1018_v30  ;;  %v389_v30 = vadd.f32 %v1682_v21, %v204_v10  ;;  %v990_v10 = vadd.f32 %v989_v59, %v1718_v56  ;;  %v984_v56 = vadd.f32 %v1706_v47, %v1702_v44 }
  0xfe   :  { %v992_v4 = vpop.f32.mrf.mxu0  ;;  %v978_v44 = vadd.f32 %v1690_v34, %v1686_v31 }
  0xff   :  { %v409_v26 = vadd.f32 %v1020_v16, %v224_v61  ;;  %v384_v61 = vadd.f32 %v1680_v18, %v199_v17 }
 0x100   :  { %v994_v8 = vpop.f32.mrf.mxu0 }
 0x102   :  { %v995_v12 = vpop.f32.mrf.mxu0 }
 0x104   :  { %v997_v22 = vpop.f32.mrf.mxu0 }
 0x106   :  { %v1688_v33 = vpop.f32.mrf.mxu1 }
 0x108   :  { %v480_v35 = vpop.f32.mrf.mxu1 }
 0x109   :  { %v189_v35 = vpop.permute.xlu1 %188 }
 0x10a   :  { %v1692_v36 = vpop.f32.mrf.mxu1 }
 0x10c   :  { %v485_v39 = vpop.f32.mrf.mxu1 }
 0x10d   :  { %v179_v3 = vpop.permute.xlu1 %178 }
 0x10e   :  { %v1696_v40 = vpop.f32.mrf.mxu1 }
 0x110   :  { %v490_v42 = vpop.f32.mrf.mxu1 }
 0x111   :  { %v184_v42 = vpop.permute.xlu0 %183 }
 0x112   :  { %v1700_v43 = vpop.f32.mrf.mxu1 }
 0x114   :  { %v495_v45 = vpop.f32.mrf.mxu1 }
 0x115   :  { %v399_v45 = vadd.f32 %v1014_v27, %v214_v1  ;;  %v996_v27 = vadd.f32 %v995_v12, %v994_v8  ;;  %v169_v8 = vpop.permute.xlu1 %168 }
 0x116   :  { %v1704_v46 = vpop.f32.mrf.mxu1 }
 0x117   :  { %v369_v14 = vadd.f32 %v996_v27, %v184_v42  ;;  %v570_v42 = vld [vmem:[%s1844_s3 + $0x18] sm:$0xff] }
 0x118   :  { %v500_v48 = vpop.f32.mrf.mxu1 }
 0x11a   :  { %v1708_v49 = vpop.f32.mrf.mxu1 }
 0x11c   :  { %v505_v51 = vpop.f32.mrf.mxu1 }
 0x11e   :  { %v1712_v52 = vpop.f32.mrf.mxu1 }
 0x11f   :  { %v509_v59 = vadd.f32 %v1712_v52, %v369_v14 }
 0x120   :  { %v510_v54 = vpop.f32.mrf.mxu1 }
 0x121   :  { %v998_v54 = vpop.f32.mrf.mxu0 }
 0x122   :  { %v1716_v55 = vpop.f32.mrf.mxu1  ;;  %v999_v29 = vadd.f32 %v998_v54, %v997_v22  ;;  %v574_v54 = vld [vmem:[%s1844_s3 + $0x38] sm:$0xff] }
 0x124   :  { %v515_v57 = vpop.f32.mrf.mxu1 }
 0x126   :  { %v1720_v58 = vpop.f32.mrf.mxu1 }
 0x128   :  { %v520_v60 = vpop.f32.mrf.mxu1 }
 0x129   :  { %v394_v60 = vadd.f32 %v1684_v24, %v209_v7  ;;  %v174_v24 = vpop.permute.xlu0 %173  ;;  %v993_v7 = vadd.f32 %v992_v4, %v991_v63 }
 0x12a   :  { %v523_v62 = vpop.f32.mrf.mxu1 }
 0x12b   :  { %v524_v21 = vadd.f32 %v523_v62, %v384_v61  ;;  %v364_v63 = vadd.f32 %v993_v7, %v179_v3 }
 0x12c   :  { %v525_v0 = vpop.f32.mrf.mxu1 }
 0x12d   :  { %v561_v4 = vmax.f32 %v524_v21, 0.0  ;;  %v164_v12 = vpop.permute.xlu0 %163 }
 0x12e   :  { %v528_v2 = vpop.f32.mrf.mxu1  ;;  %v349_v47 = vadd.f32 %v984_v56, %v164_v12 }
 0x12f   :  { %v529_v1 = vadd.f32 %v528_v2, %v389_v30 }
 0x130   :  { %v530_v5 = vpop.f32.mrf.mxu1 }
 0x131   :  { %v562_v2 = vmax.f32 %v529_v1, 0.0  ;;  %v154_v22 = vpop.permute.xlu0 %153 }
 0x132   :  { %v533_v6 = vpop.f32.mrf.mxu1 }
 0x133   :  { %v534_v32 = vadd.f32 %v533_v6, %v394_v60  ;;  %v576_v60 = vld [vmem:[%s1844_s3 + $0x48] sm:$0xff] }
 0x134   :  { %v535_v9 = vpop.f32.mrf.mxu1 }
 0x135   :  { %v563_v6 = vmax.f32 %v534_v32, 0.0  ;;  %v637_v14 = vpop.permute.xlu0 %636 }
 0x136   :  { %v538_v11 = vpop.f32.mrf.mxu1 }
 0x137   :  { %v539_v0 = vadd.f32 %v538_v11, %v399_v45  ;;  %v374_v11 = vadd.f32 %v999_v29, %v189_v35  ;;  %v571_v45 = vld [vmem:[%s1844_s3 + $0x20] sm:$0xff] }
 0x138   :  { %v540_v13 = vpop.f32.mrf.mxu1 }
 0x139   :  { %v564_v9 = vmax.f32 %v539_v0, 0.0  ;;  %v379_v13 = vadd.f32 %v1678_v15, %v194_v20  ;;  %v987_v15 = vadd.f32 %v1714_v53, %v1710_v50  ;;  %v514_v62 = vadd.f32 %v1716_v55, %v374_v11  ;;  %v577_v0 = vld [vmem:[%s1844_s3 + $0x50] sm:$0xf] }
 0x13a   :  { %v543_v19 = vpop.f32.mrf.mxu1  ;;  %v981_v50 = vadd.f32 %v1698_v41, %v1694_v38  ;;  %v504_v55 = vadd.f32 %v1708_v49, %v364_v63  ;;  %v558_v20 = vmax.f32 %v509_v59, 0.0  ;;  %v627_v63 = vpop.permute.xlu0 %626 }
 0x13b   :  { %v544_v48 = vadd.f32 %v543_v19, %v404_v25  ;;  %v519_v18 = vadd.f32 %v1720_v58, %v379_v13  ;;  %v359_v58 = vadd.f32 %v990_v10, %v174_v24  ;;  %v354_v53 = vadd.f32 %v987_v15, %v169_v8  ;;  %v159_v19 = vpop.permute.xlu1 %158 }
 0x13c   :  { %v545_v23 = vpop.f32.mrf.mxu1  ;;  %v559_v17 = vmax.f32 %v514_v62, 0.0  ;;  %v344_v38 = vadd.f32 %v981_v50, %v159_v19  ;;  %v557_v49 = vmax.f32 %v504_v55, 0.0  ;;  %v489_v25 = vadd.f32 %v1696_v40, %v349_v47 }
 0x13d   :  { %v565_v5 = vmax.f32 %v544_v48, 0.0  ;;  %v560_v16 = vmax.f32 %v519_v18, 0.0  ;;  %v499_v52 = vadd.f32 %v1704_v46, %v359_v58  ;;  %v494_v41 = vadd.f32 %v1700_v43, %v354_v53  ;;  %v572_v48 = vld [vmem:[%s1844_s3 + $0x28] sm:$0xff] }
 0x13e   :  { %v548_v39 = vpop.f32.mrf.mxu1  ;;  %v339_v23 = vadd.f32 %v978_v44, %v154_v22  ;;  %v484_v31 = vadd.f32 %v1692_v36, %v344_v38  ;;  %v554_v43 = vmax.f32 %v489_v25, 0.0  ;;  %v567_v36 = vld [vmem:[%s1844_s3] sm:$0xff]  ;;  %v617_v53 = vpop.permute.xlu0 %616 }
 0x13f   :  { %v549_v51 = vadd.f32 %v548_v39, %v409_v26  ;;  %v556_v26 = vmax.f32 %v499_v52, 0.0  ;;  %v555_v34 = vmax.f32 %v494_v41, 0.0  ;;  %v569_v39 = vld [vmem:[%s1844_s3 + $0x10] sm:$0xff]  ;;  %v642_v21 = vpop.permute.xlu1 %641 }
 0x140   :  { %v550_v57 = vpop.f32.mrf.mxu1  ;;  %v479_v46 = vadd.f32 %v1688_v33, %v339_v23  ;;  %v553_v35 = vmax.f32 %v484_v31, 0.0  ;;  %v568_v33 = vld [vmem:[%s1844_s3 + $0x8] sm:$0xff] }
 0x141   :  { %v566_v28 = vmax.f32 %v549_v51, 0.0  ;;  %v573_v51 = vld [vmem:[%s1844_s3 + $0x30] sm:$0xff]  ;;  %v575_v57 = vld [vmem:[%s1844_s3 + $0x40] sm:$0xff] }
 0x142   :  { %v552_v40 = vmax.f32 %v479_v46, 0.0  ;;  %v607_v22 = vpop.permute.xlu0 %606 }
 0x143   :  { %1061 = vmatpush3.msra.mxu0 %v566_v28  ;;  %v809_v28 = vld [vmem:[%s1845_s5] sm:$0xff] }
 0x144   :  { %1062 = vmatprep.subr.mxu0 %v1186_v37 }
 0x145   :  { %1063 = vmatpush3.msra.mxu0 %v565_v5 }
 0x146   :  { %1064 = vmatprep.subr.mxu0 %v1186_v37 }
 0x147   :  { %1065 = vmatpush3.msra.mxu0 %v564_v9 }
 0x148   :  { %1066 = vmatprep.subr.mxu0 %v1186_v37 }
 0x149   :  { %1067 = vmatpush3.msra.mxu0 %v563_v6 }
 0x14a   :  { %1068 = vmatprep.subr.mxu0 %v1186_v37 }
 0x14b   :  { %1069 = vmatpush3.msra.mxu0 %v562_v2  ;;  %v632_v2 = vpop.permute.xlu1 %631 }
 0x14c   :  { %1070 = vmatprep.subr.mxu0 %v1186_v37 }
 0x14d   :  { %1071 = vmatpush3.msra.mxu0 %v561_v4 }
 0x14e   :  { %1072 = vmatprep.subr.mxu0 %v1186_v37 }
 0x14f   :  { %1073 = vmatpush3.msra.mxu0 %v560_v16  ;;  %v622_v4 = vpop.permute.xlu1 %621 }
 0x150   :  { %1074 = vmatprep.subr.mxu0 %v1186_v37 }
 0x151   :  { %1075 = vmatpush3.msra.mxu0 %v559_v17 }
 0x152   :  { %1076 = vmatprep.subr.mxu0 %v1186_v37 }
 0x153   :  { %1077 = vmatpush3.msra.mxu0 %v558_v20  ;;  %v612_v19 = vpop.permute.xlu1 %611 }
 0x154   :  { %1078 = vmatprep.subr.mxu0 %v1186_v37 }
 0x155   :  { %1079 = vmatpush3.msra.mxu0 %v557_v49 }
 0x156   :  { %1080 = vmatprep.subr.mxu0 %v1186_v37 }
 0x157   :  { %1081 = vmatpush3.msra.mxu0 %v556_v26  ;;  %v602_v49 = vpop.permute.xlu1 %601 }
 0x158   :  { %1082 = vmatprep.subr.mxu0 %v1186_v37 }
 0x159   :  { %1083 = vmatpush3.msra.mxu0 %v555_v34  ;;  %v597_v34 = vpop.permute.xlu0 %596 }
 0x15a   :  { %1084 = vmatprep.subr.mxu0 %v1186_v37 }
 0x15b   :  { %1085 = vmatpush3.msra.mxu0 %v554_v43 }
 0x15c   :  { %1086 = vmatprep.subr.mxu0 %v1186_v37 }
 0x15d   :  { %1087 = vmatpush3.msra.mxu0 %v553_v35  ;;  %v592_v35 = vpop.permute.xlu1 %591 }
 0x15e   :  { %1088 = vmatprep.subr.mxu0 %v1186_v37 }
 0x15f   :  { %1089 = vmatpush3.msra.mxu0 %v552_v40 }
 0x160   :  { %1091 = vmatmul.mubr.msk.f32.vlgmr.msra.gmra.mxu0 %vm644_vm2, %v567_v36 }
 0x161   :  { %1093 = vmatprep.mubr.msk.f32.mxu0 %vm1187_vm1, %v1186_v37 }
 0x164   :  { %1094 = vmatmul.mubr.msk.f32.gmra.mxu0 %vm644_vm2, %v568_v33 }
 0x165   :  { %1096 = vmatprep.mubr.msk.f32.mxu0 %vm1187_vm1, %v1186_v37 }
 0x168   :  { %1097 = vmatmul.mubr.msk.f32.gmra.mxu0 %vm644_vm2, %v569_v39 }
 0x169   :  { %1099 = vmatprep.mubr.msk.f32.mxu0 %vm1187_vm1, %v1186_v37 }
 0x16c   :  { %1100 = vmatmul.mubr.msk.f32.gmra.mxu0 %vm644_vm2, %v570_v42  ;;  %v810_v42 = vld [vmem:[%s1845_s5 + $0x8] sm:$0x3] }
 0x16d   :  { %1102 = vmatprep.mubr.msk.f32.mxu0 %vm1187_vm1, %v1186_v37 }
 0x170   :  { %1103 = vmatmul.mubr.msk.f32.gmra.mxu0 %vm644_vm2, %v571_v45  ;;  %v821_v45 = vpop.permute.xlu1 %820 }
 0x171   :  { %1105 = vmatprep.mubr.msk.f32.mxu0 %vm1187_vm1, %v1186_v37 }
 0x174   :  { %1106 = vmatmul.mubr.msk.f32.gmra.mxu0 %vm644_vm2, %v572_v48 }
 0x175   :  { %1108 = vmatprep.mubr.msk.f32.mxu0 %vm1187_vm1, %v1186_v37 }
 0x178   :  { %1109 = vmatmul.mubr.msk.f32.gmra.mxu0 %vm644_vm2, %v573_v51 }
 0x179   :  { %1111 = vmatprep.mubr.msk.f32.mxu0 %vm1187_vm1, %v1186_v37 }
 0x17c   :  { %1112 = vmatmul.mubr.msk.f32.gmra.mxu0 %vm644_vm2, %v574_v54  ;;  %v816_v54 = vpop.permute.xlu0 %815 }
 0x17d   :  { %1114 = vmatprep.mubr.msk.f32.mxu0 %vm1187_vm1, %v1186_v37 }
 0x180   :  { %1115 = vmatmul.mubr.msk.f32.gmra.mxu0 %vm644_vm2, %v575_v57 }
 0x181   :  { %1117 = vmatprep.mubr.msk.f32.mxu0 %vm1187_vm1, %v1186_v37 }
 0x184   :  { %1118 = vmatmul.mubr.msk.f32.gmra.mxu0 %vm644_vm2, %v576_v60 }
 0x185   :  { %1120 = vmatprep.mubr.msk.f32.mxu0 %vm1187_vm1, %v1186_v37 }
 0x188   :  { %1121 = vmatmul.mubr.msk.f32.gmra.mxu0 %vm644_vm2, %v577_v0 }
 0x189   :  { %1145 = vmatprep.mubr.msk.f32.mxu0 %vm823_vm3, %v809_v28 }
 0x220   :  { %v1826_v29 = vpop.f32.mrf.mxu0 }
 0x221   :  { %v745_v40 = vadd.f32 %v1826_v29, %v592_v35 }
 0x222   :  { %v1092_v30 = vpop.f32.mrf.mxu0 }
 0x223   :  { %v798_v39 = vmax.f32 %v745_v40, 0.0 }
 0x224   :  { %v749_v32 = vpop.f32.mrf.mxu0 }
 0x225   :  { %v750_v46 = vadd.f32 %v749_v32, %v597_v34 }
 0x226   :  { %v1095_v5 = vpop.f32.mrf.mxu0 }
 0x227   :  { %v799_v33 = vmax.f32 %v750_v46, 0.0 }
 0x228   :  { %v754_v3 = vpop.f32.mrf.mxu0 }
 0x229   :  { %v755_v26 = vadd.f32 %v754_v3, %v602_v49 }
 0x22a   :  { %v1098_v37 = vpop.f32.mrf.mxu0 }
 0x22b   :  { %v800_v36 = vmax.f32 %v755_v26, 0.0 }
 0x22c   :  { %v759_v61 = vpop.f32.mrf.mxu0 }
 0x22d   :  { %v760_v23 = vadd.f32 %v759_v61, %v607_v22 }
 0x22e   :  { %v1101_v27 = vpop.f32.mrf.mxu0 }
 0x22f   :  { %v801_v43 = vmax.f32 %v760_v23, 0.0 }
 0x230   :  { %v764_v1 = vpop.f32.mrf.mxu0 }
 0x231   :  { %v765_v38 = vadd.f32 %v764_v1, %v612_v19 }
 0x232   :  { %v1104_v9 = vpop.f32.mrf.mxu0 }
 0x233   :  { %v802_v31 = vmax.f32 %v765_v38, 0.0 }
 0x234   :  { %v769_v13 = vpop.f32.mrf.mxu0 }
 0x235   :  { %v770_v52 = vadd.f32 %v769_v13, %v617_v53 }
 0x236   :  { %v1107_v24 = vpop.f32.mrf.mxu0 }
 0x237   :  { %v803_v25 = vmax.f32 %v770_v52, 0.0 }
 0x238   :  { %v774_v7 = vpop.f32.mrf.mxu0 }
 0x239   :  { %v775_v44 = vadd.f32 %v774_v7, %v622_v4 }
 0x23a   :  { %v1110_v11 = vpop.f32.mrf.mxu0 }
 0x23b   :  { %v804_v41 = vmax.f32 %v775_v44, 0.0 }
 0x23c   :  { %v779_v6 = vpop.f32.mrf.mxu0 }
 0x23d   :  { %v780_v55 = vadd.f32 %v779_v6, %v627_v63 }
 0x23e   :  { %v1113_v10 = vpop.f32.mrf.mxu0 }
 0x23f   :  { %v805_v20 = vmax.f32 %v780_v55, 0.0 }
 0x240   :  { %v784_v18 = vpop.f32.mrf.mxu0 }
 0x241   :  { %v785_v16 = vadd.f32 %v784_v18, %v632_v2 }
 0x242   :  { %v1116_v8 = vpop.f32.mrf.mxu0 }
 0x243   :  { %v806_v47 = vmax.f32 %v785_v16, 0.0 }
 0x244   :  { %v789_v15 = vpop.f32.mrf.mxu0 }
 0x245   :  { %v790_v56 = vadd.f32 %v789_v15, %v637_v14 }
 0x246   :  { %v1119_v62 = vpop.f32.mrf.mxu0 }
 0x247   :  { %v807_v17 = vmax.f32 %v790_v56, 0.0 }
 0x248   :  { %v794_v12 = vpop.f32.mrf.mxu0 }
 0x249   :  { %v795_v58 = vadd.f32 %v794_v12, %v642_v21 }
 0x24a   :  { %v1122_v59 = vpop.f32.mrf.mxu0 }
 0x24b   :  { %v808_v50 = vmax.f32 %v795_v58, 0.0 }
 0x24d   :  { %1123 = vmatprep.subr.msk.mxu0 %vm830_vm4, %v808_v50 }
 0x24e   :  { %1124 = vmatpush3.msk.msra.mxu0 %vm830_vm4, %v808_v50 }
 0x24f   :  { %1125 = vmatprep.subr.mxu0 %v807_v17 }
 0x250   :  { %1126 = vmatpush3.msra.mxu0 %v807_v17 }
 0x251   :  { %1127 = vmatprep.subr.mxu0 %v806_v47 }
 0x252   :  { %1128 = vmatpush3.msra.mxu0 %v806_v47 }
 0x253   :  { %1129 = vmatprep.subr.mxu0 %v805_v20 }
 0x254   :  { %1130 = vmatpush3.msra.mxu0 %v805_v20 }
 0x255   :  { %1131 = vmatprep.subr.mxu0 %v804_v41 }
 0x256   :  { %1132 = vmatpush3.msra.mxu0 %v804_v41 }
 0x257   :  { %1133 = vmatprep.subr.mxu0 %v803_v25 }
 0x258   :  { %1134 = vmatpush3.msra.mxu0 %v803_v25 }
 0x259   :  { %1135 = vmatprep.subr.mxu0 %v802_v31 }
 0x25a   :  { %1136 = vmatpush3.msra.mxu0 %v802_v31 }
 0x25b   :  { %1137 = vmatprep.subr.mxu0 %v801_v43 }
 0x25c   :  { %1138 = vmatpush3.msra.mxu0 %v801_v43 }
 0x25d   :  { %1139 = vmatprep.subr.mxu0 %v800_v36 }
 0x25e   :  { %1140 = vmatpush3.msra.mxu0 %v800_v36 }
 0x25f   :  { %1141 = vmatprep.subr.mxu0 %v799_v33 }
 0x260   :  { %1142 = vmatpush3.msra.mxu0 %v799_v33 }
 0x261   :  { %1143 = vmatprep.subr.mxu0 %v798_v39 }
 0x262   :  { %1144 = vmatpush3.msra.mxu0 %v798_v39 }
 0x263   :  { %1146 = vmatmul.mubr.msk.f32.vlgmr.msra.gmra.mxu0 %vm823_vm3, %v810_v42 }
 0x323   :  { %v1147_v48 = vpop.f32.mrf.mxu0 }
 0x324   :  { %v906_v51 = vadd.f32 %v1147_v48, %v821_v45 }
 0x325   :  { %v900_v57 = vpop.f32.mrf.mxu0 }
 0x326   :  { %910 = vst [vmem:[%s1846_s7 + $0x8] sm:$0x3] %v906_v51  ;;  %v901_v60 = vadd.f32 %v900_v57, %v816_v54 }
 0x328   :  { %909 = vst [vmem:[%s1846_s7] sm:$0xff] %v901_v60 }

</bundles_post_ra>
